<compile_context>
chip_gen: v6e
topology: v6e:2x2x1
jax: 0.10.0
libtpu: 0.0.40
codegen_flags: <defaults>
</compile_context>

<pallas_src>
import functools
import math

import jax
import jax.numpy as jnp
from jax.experimental import pallas as pl
from jax.experimental.pallas import tpu as pltpu

LANE = 128
SUBLANE = 8
TM_MAX = 512          # matmul M tile
TK_MAX = 512          # matmul K tile
TN_MAX = 256          # matmul N tile
QT_M = 256            # quantizer M tile
VMEM_LIMIT = 32 * 1024 * 1024   # safe scoped-VMEM budget on v5e/v6e/v7x


def _round_up(x, m):
    return ((x + m - 1) // m) * m


_MM_COMPILER_PARAMS = pltpu.CompilerParams(
    dimension_semantics=("parallel", "parallel", "arbitrary"),
    vmem_limit_bytes=VMEM_LIMIT)

_QT_COMPILER_PARAMS = pltpu.CompilerParams(
    dimension_semantics=("arbitrary",),
    vmem_limit_bytes=VMEM_LIMIT)


# ----------------------------------------------------------------------------
# Pallas kernel 1: tiled matmul with fused (pre-ReLU) -> bias -> ReLU -> +residual
# Used for every Conv1d (after im2col) in encoder / decoder / res-blocks.
# ----------------------------------------------------------------------------
def _mm_bias_act_kernel(x_ref, w_ref, b_ref, *rest, act, pre_act, has_res):
    if has_res:
        res_ref, o_ref, acc_ref = rest
    else:
        o_ref, acc_ref = rest
    k = pl.program_id(2)

    @pl.when(k == 0)
    def _():
        acc_ref[...] = jnp.zeros_like(acc_ref)

    x = x_ref[...]                         # bf16 (tm, tk)
    if pre_act == "relu":
        x = jnp.maximum(x, 0.0)            # exact: ReLU commutes with the bf16 cast
    acc_ref[...] += jnp.dot(x, w_ref[...], preferred_element_type=jnp.float32)

    @pl.when(k == pl.num_programs(2) - 1)
    def _():
        out = acc_ref[...] + b_ref[...]    # bias + activation on the f32 accumulator
        if act == "relu":
            out = jnp.maximum(out, 0.0)
        if has_res:
            out = out + res_ref[...]       # fused residual add (ResConv1DBlock)
        o_ref[...] = out.astype(o_ref.dtype)


def _mm_bias_act(xcol, layer, *, act=None, pre_act=None, residual=None):
    """xcol: (M, K*Cin) bf16.  layer holds pre-padded bf16 weights / f32 bias."""
    M, KC = xcol.shape
    w, b = layer["w"], layer["b"]
    Kp, Np = w.shape
    assert KC == layer["kc"]
    tk, tn = layer["tk"], layer["tn"]
    tm = min(TM_MAX, _round_up(M, SUBLANE))
    Mp = _round_up(M, tm)

    x_p = jnp.pad(xcol, ((0, Mp - M), (0, Kp - KC)))
    has_res = residual is not None

    in_specs = [pl.BlockSpec((tm, tk), lambda i, j, k: (i, k)),
                pl.BlockSpec((tk, tn), lambda i, j, k: (k, j)),
                pl.BlockSpec((1, tn), lambda i, j, k: (0, j))]
    args = [x_p, w, b]
    if has_res:
        r_p = jnp.pad(residual.astype(jnp.float32),
                      ((0, Mp - M), (0, Np - residual.shape[1])))
        in_specs.append(pl.BlockSpec((tm, tn), lambda i, j, k: (i, j)))
        args.append(r_p)

    flops = 2 * Mp * Np * Kp
    bytes_accessed = (Mp * Kp * 2 + Kp * Np * 2 + Np * 4
                      + Mp * Np * 4 * (2 if has_res else 1))

    out = pl.pallas_call(
        functools.partial(_mm_bias_act_kernel, act=act, pre_act=pre_act,
                          has_res=has_res),
        out_shape=jax.ShapeDtypeStruct((Mp, Np), jnp.float32),
        grid=(Mp // tm, Np // tn, Kp // tk),
        in_specs=in_specs,
        out_specs=pl.BlockSpec((tm, tn), lambda i, j, k: (i, j)),
        scratch_shapes=[pltpu.VMEM((tm, tn), jnp.float32)],
        compiler_params=_MM_COMPILER_PARAMS,
        cost_estimate=pl.CostEstimate(flops=flops, transcendentals=0,
                                      bytes_accessed=bytes_accessed),
    )(*args)
    return out[:M, :layer["cout"]]


# ----------------------------------------------------------------------------
# im2col glue (plain JAX) — builds the (B*L_out, K*Cin) slab fed to the kernel.
# ----------------------------------------------------------------------------
def _im2col(x, K, stride, padding, dilation):
    B, L, C = x.shape
    Lp = L + 2 * padding
    L_out = (Lp - dilation * (K - 1) - 1) // stride + 1
    xp = jnp.pad(x, ((0, 0), (padding, padding), (0, 0)))
    cols = [xp[:, k * dilation: k * dilation + stride * (L_out - 1) + 1: stride, :]
            for k in range(K)]
    return jnp.concatenate(cols, axis=-1), L_out


def _im2col_upsample2(x, K, padding, dilation):
    """Nearest-neighbor 2x temporal upsample fused into the im2col gather
    (the repeated tensor is never materialized)."""
    B, L, C = x.shape
    L_up = 2 * L
    L_out = L_up + 2 * padding - dilation * (K - 1)   # stride == 1
    t = jnp.arange(L_out)
    cols = []
    for k in range(K):
        q = t + k * dilation - padding                # index into the upsampled signal
        valid = ((q >= 0) & (q < L_up)).astype(x.dtype)
        src = jnp.clip(q // 2, 0, L - 1)              # upsampled[q] = x[q // 2]
        cols.append(jnp.take(x, src, axis=1) * valid[None, :, None])
    return jnp.concatenate(cols, axis=-1), L_out


def conv1d(x, layer, *, stride=1, padding=0, dilation=1, act=None, pre_act=None,
           upsample=1, residual=None):
    """Conv1d matching torch.nn.Conv1d on channels-last (B, L, Cin) input."""
    B, L, Cin = x.shape
    K = layer["ksize"]
    assert Cin == layer["cin"]
    xb = x.astype(jnp.bfloat16)   # bf16 activations into the MXU (f32 accumulate)
    if upsample == 1:
        xcol, L_out = _im2col(xb, K, stride, padding, dilation)
    else:
        assert stride == 1 and upsample == 2
        xcol, L_out = _im2col_upsample2(xb, K, padding, dilation)
    xcol = xcol.reshape(B * L_out, K * Cin)
    res = residual.reshape(B * L_out, -1) if residual is not None else None
    out = _mm_bias_act(xcol, layer, act=act, pre_act=pre_act, residual=res)
    return out.reshape(B, L_out, layer["cout"])


# ----------------------------------------------------------------------------
# Pallas kernel 2: 'orig' vector quantizer, tiled over M with resident codebook.
#   argmin_j ( ||e_j||^2 - 2 z.e_j )  (the ||z||^2 term cannot change the argmin)
#   z_q = onehot @ e ; accumulates per-code usage counts and sum((z_q - z)^2).
# ----------------------------------------------------------------------------
def _quantize_kernel(z_ref, cbt_ref, e2_ref, zq_ref, cnt_ref, sse_ref, *, m_real, tm):
    i = pl.program_id(0)

    @pl.when(i == 0)
    def _():
        cnt_ref[...] = jnp.zeros_like(cnt_ref)
        sse_ref[...] = jnp.zeros_like(sse_ref)

    z = z_ref[...]                                      # (tm, Dp) f32
    cbt = cbt_ref[...]                                  # (Dp, Ncp) f32, resident
    zdot = jnp.dot(z, cbt, preferred_element_type=jnp.float32)      # (tm, Ncp)
    d = e2_ref[...] - 2.0 * zdot                        # padded codes have e2 = 1e30

    dmin = jnp.min(d, axis=1, keepdims=True)
    code_iota = jax.lax.broadcasted_iota(jnp.int32, d.shape, 1)
    ncp = d.shape[1]
    idx = jnp.min(jnp.where(d <= dmin, code_iota, ncp), axis=1, keepdims=True)
    onehot = (code_iota == idx).astype(jnp.float32)     # (tm, Ncp)

    zq = jax.lax.dot_general(onehot, cbt, (((1,), (1,)), ((), ())),
                             preferred_element_type=jnp.float32)    # (tm, Dp)
    zq_ref[...] = zq

    # Mask out the rows added by M padding so counts / SSE stay exact.
    row = i * tm + jax.lax.broadcasted_iota(jnp.int32, (tm, 1), 0)
    valid = (row < m_real).astype(jnp.float32)          # (tm, 1)
    cnt_ref[...] += jnp.sum(onehot * valid, axis=0, keepdims=True)  # (1, Ncp)
    diff = (zq - z) * valid
    sse_row = jnp.sum(diff * diff, axis=0, keepdims=True)           # (1, Dp)
    sse_ref[...] += jnp.sum(sse_row, axis=1, keepdims=True)         # (1, 1)


def quantize_pallas(z_flat, qparams):
    M, D = z_flat.shape
    cbt, e2 = qparams["cbt"], qparams["e2"]
    Dp, Ncp = cbt.shape
    nc = qparams["nb_code"]
    assert D == qparams["code_dim"]

    tm = min(QT_M, _round_up(M, SUBLANE))
    Mp = _round_up(M, tm)
    z_p = jnp.pad(z_flat.astype(jnp.float32), ((0, Mp - M), (0, Dp - D)))

    zq, counts, sse = pl.pallas_call(
        functools.partial(_quantize_kernel, m_real=M, tm=tm),
        out_shape=(jax.ShapeDtypeStruct((Mp, Dp), jnp.float32),
                   jax.ShapeDtypeStruct((1, Ncp), jnp.float32),
                   jax.ShapeDtypeStruct((1, 1), jnp.float32)),
        grid=(Mp // tm,),
        in_specs=[pl.BlockSpec((tm, Dp), lambda i: (i, 0)),
                  pl.BlockSpec((Dp, Ncp), lambda i: (0, 0)),   # codebook resident
                  pl.BlockSpec((1, Ncp), lambda i: (0, 0))],
        out_specs=(pl.BlockSpec((tm, Dp), lambda i: (i, 0)),
                   pl.BlockSpec((1, Ncp), lambda i: (0, 0)),   # accumulated in VMEM
                   pl.BlockSpec((1, 1), lambda i: (0, 0))),
        compiler_params=_QT_COMPILER_PARAMS,
        cost_estimate=pl.CostEstimate(
            flops=4 * Mp * Ncp * Dp, transcendentals=0,
            bytes_accessed=2 * Mp * Dp * 4 + Dp * Ncp * 4 + Ncp * 4),
    )(z_p, cbt, e2)
    return zq[:M, :D], counts[0, :nc], sse[0, 0]


# ----------------------------------------------------------------------------
# Parameter construction (deterministic, torch-like init; matmul-ready layout)
# ----------------------------------------------------------------------------
def _pick_tn(Np):
    if Np <= TN_MAX:
        return Np
    return TN_MAX if Np % TN_MAX == 0 else LANE


def _pack_conv(key, cin, cout, k):
    kw, kb = jax.random.split(key)
    bound = 1.0 / math.sqrt(cin * k)
    w = jax.random.uniform(kw, (cout, cin, k), jnp.float32, -bound, bound)
    b = jax.random.uniform(kb, (cout,), jnp.float32, -bound, bound)
    # Precompute the matmul layout once: (K*Cin, Cout), lane-dense padded, bf16.
    wmat = jnp.transpose(w, (2, 1, 0)).reshape(k * cin, cout)
    kc = k * cin
    Np = _round_up(cout, LANE)
    tn = _pick_tn(Np)
    tk = min(TK_MAX, _round_up(kc, LANE))
    Kp = _round_up(kc, tk)
    w_pad = jnp.pad(wmat, ((0, Kp - kc), (0, Np - cout))).astype(jnp.bfloat16)
    b_pad = jnp.pad(b, (0, Np - cout)).reshape(1, Np)
    return dict(w=w_pad, b=b_pad, kc=kc, cin=cin, cout=cout, ksize=k, tk=tk, tn=tn)


def build_vqvae_params(key, *, input_dim, nb_code, code_dim, output_emb_width,
                       down_t, stride_t, width, depth, dilation_growth_rate):
    keys = iter(jax.random.split(key, 256))
    filter_t, pad_t = stride_t * 2, stride_t // 2

    def res_blocks():
        dils = [dilation_growth_rate ** d for d in range(depth)][::-1]  # reverse_dilation
        out = []
        for dl in dils:
            c1 = _pack_conv(next(keys), width, width, 3)
            c2 = _pack_conv(next(keys), width, width, 1)
            out.append(("res", (c1, c2), {"dilation": dl}))
        return out

    enc = [("conv", _pack_conv(next(keys), input_dim, width, 3),
            dict(stride=1, padding=1, dilation=1, act="relu"))]
    for _ in range(down_t):
        enc.append(("conv", _pack_conv(next(keys), width, width, filter_t),
                    dict(stride=stride_t, padding=pad_t, dilation=1, act=None)))
        enc += res_blocks()
    enc.append(("conv", _pack_conv(next(keys), width, output_emb_width, 3),
                dict(stride=1, padding=1, dilation=1, act=None)))

    dec = [("conv", _pack_conv(next(keys), output_emb_width, width, 3),
            dict(stride=1, padding=1, dilation=1, act="relu"))]
    for _ in range(down_t):
        dec += res_blocks()
        # nn.Upsample(scale_factor=2, mode='nearest') + Conv1d fused into one layer.
        dec.append(("upconv", _pack_conv(next(keys), width, width, 3),
                    dict(stride=1, padding=1, dilation=1, act=None)))
    dec.append(("conv", _pack_conv(next(keys), width, width, 3),
                dict(stride=1, padding=1, dilation=1, act="relu")))
    dec.append(("conv", _pack_conv(next(keys), width, input_dim, 3),
                dict(stride=1, padding=1, dilation=1, act=None)))

    # 'orig' Quantizer codebook: stored transposed, lane-dense padded, with
    # precomputed ||e||^2 (padded dummy codes get 1e30 so they never win argmin).
    cb = jax.random.uniform(next(keys), (nb_code, code_dim), jnp.float32,
                            -1.0 / nb_code, 1.0 / nb_code)
    Dp, Ncp = _round_up(code_dim, LANE), _round_up(nb_code, LANE)
    cbt = jnp.pad(cb.T, ((0, Dp - code_dim), (0, Ncp - nb_code)))
    e2 = jnp.sum(cbt * cbt, axis=0, keepdims=True)
    e2 = e2.at[0, nb_code:].set(1e30)
    quant = dict(cbt=cbt, e2=e2, nb_code=nb_code, code_dim=code_dim, beta=1.0)

    return {"encoder": enc, "decoder": dec, "quantizer": quant}


def apply_layers(layers, x):
    for kind, p, cfg in layers:
        if kind == "conv":
            x = conv1d(x, p, stride=cfg["stride"], padding=cfg["padding"],
                       dilation=cfg["dilation"], act=cfg["act"])
        elif kind == "upconv":
            x = conv1d(x, p, stride=1, padding=cfg["padding"],
                       dilation=cfg["dilation"], act=cfg["act"], upsample=2)
        elif kind == "res":
            # ResConv1DBlock: x = x + conv2(relu(conv1(relu(x))))
            c1, c2 = p
            dil = cfg["dilation"]
            h = conv1d(x, c1, stride=1, padding=dil, dilation=dil,
                       act="relu", pre_act="relu")
            x = conv1d(h, c2, stride=1, padding=0, dilation=1, act=None,
                       residual=x)              # residual add fused into the kernel
    return x


def vqvae_forward(params, x):
    """x: (N, T, input_dim) -> (x_out (N, T, input_dim), loss, perplexity)."""
    xf = x.astype(jnp.float32)                              # preprocess (.float())
    enc = apply_layers(params["encoder"], xf)               # (N, T', code_dim)
    N, Tq, D = enc.shape
    z_flat = enc.reshape(N * Tq, D)

    q = params["quantizer"]
    zq_flat, counts, sse = quantize_pallas(z_flat, q)
    M = N * Tq
    mse = sse / (M * D)
    # forward value of: mean((z_q - sg(z))**2) + beta * mean((sg(z_q) - z)**2)
    loss = mse + q["beta"] * mse
    # TODO(synk): straight-through gradient (z + (z_q - z).detach()) is an autograd
    # construct; the forward value is identical to z_q, which is what we propagate.
    e_mean = counts / M
    perplexity = jnp.exp(-jnp.sum(e_mean * jnp.log(e_mean + 1e-10)))

    zq = zq_flat.reshape(N, Tq, D)
    dec = apply_layers(params["decoder"], zq)               # (N, T, input_dim)
    return dec, loss, perplexity


if __name__ == "__main__":
    # Small-but-consistent hyperparameters (defaults scaled down).
    N, T, INPUT_DIM = 2, 16, 8
    NB_CODE, CODE_DIM, OUT_EMB = 64, 32, 32
    DOWN_T, STRIDE_T, WIDTH, DEPTH, DGR = 2, 2, 32, 2, 3

    key = jax.random.PRNGKey(0)
    kp, kx = jax.random.split(key)
    params = build_vqvae_params(
        kp, input_dim=INPUT_DIM, nb_code=NB_CODE, code_dim=CODE_DIM,
        output_emb_width=OUT_EMB, down_t=DOWN_T, stride_t=STRIDE_T,
        width=WIDTH, depth=DEPTH, dilation_growth_rate=DGR)

    x = jax.random.normal(kx, (N, T, INPUT_DIM), jnp.float32)

    fwd = jax.jit(lambda inp: vqvae_forward(params, inp))
    x_out, loss, perplexity = fwd(x)
    jax.block_until_ready((x_out, loss, perplexity))

    assert x_out.shape == (N, T, INPUT_DIM)
    assert x_out.dtype == jnp.float32
    assert loss.shape == () and perplexity.shape == ()
    assert bool(jnp.isfinite(loss)) and bool(jnp.isfinite(perplexity))
    print("KERNEL_OK")
</pallas_src>

<mosaic_0001>
module attributes {stable_mosaic.version = 11 : i64} {
  func.func @_mm_bias_act_kernel(%arg0: i32, %arg1: i32, %arg2: i32, %arg3: memref<32x128xbf16, #tpu.memory_space<vmem>>, %arg4: memref<128x128xbf16, #tpu.memory_space<vmem>>, %arg5: memref<1x128xf32, #tpu.memory_space<vmem>>, %arg6: memref<32x128xf32, #tpu.memory_space<vmem>>, %arg7: memref<32x128xf32, #tpu.memory_space<vmem>>) attributes {dimension_semantics = [#tpu.dimension_semantics<parallel>, #tpu.dimension_semantics<parallel>, #tpu.dimension_semantics<arbitrary>], iteration_bounds = array<i64: 1, 1, 1>, scalar_prefetch = 0 : i64, scratch_operands = 1 : i64, tpu.core_type = #tpu.core_type<tc>, window_params = [{transform_indices = @transform_0, window_bounds = array<i64: 32, 128>}, {transform_indices = @transform_1, window_bounds = array<i64: 128, 128>}, {transform_indices = @transform_2, window_bounds = array<i64: 1, 128>}, {transform_indices = @transform_3, window_bounds = array<i64: 32, 128>}]} {
    %c0_i32 = arith.constant 0 : i32
    %0 = arith.cmpi eq, %arg2, %c0_i32 : i32
    %1 = arith.extui %0 : i1 to i32
    %c0_i32_0 = arith.constant 0 : i32
    %2 = arith.cmpi ne, %1, %c0_i32_0 : i32
    scf.if %2 {
      %cst_10 = arith.constant 0.000000e+00 : f32
      %12 = vector.broadcast %cst_10 : f32 to vector<32x128xf32>
      %c0_11 = arith.constant 0 : index
      %c0_12 = arith.constant 0 : index
      %13 = vector.load %arg7[%c0_11, %c0_12] : memref<32x128xf32, #tpu.memory_space<vmem>>, vector<32x128xf32>
      tpu.vector_store %arg7[%c0_11, %c0_12], %12 {strides = array<i32>} : memref<32x128xf32, #tpu.memory_space<vmem>>, vector<32x128xf32>,
    } else {
    }
    %c0 = arith.constant 0 : index
    %c0_1 = arith.constant 0 : index
    %3 = vector.load %arg3[%c0, %c0_1] : memref<32x128xbf16, #tpu.memory_space<vmem>>, vector<32x128xbf16>
    %c0_2 = arith.constant 0 : index
    %c0_3 = arith.constant 0 : index
    %4 = vector.load %arg7[%c0_2, %c0_3] : memref<32x128xf32, #tpu.memory_space<vmem>>, vector<32x128xf32>
    %c0_4 = arith.constant 0 : index
    %c0_5 = arith.constant 0 : index
    %5 = vector.load %arg4[%c0_4, %c0_5] : memref<128x128xbf16, #tpu.memory_space<vmem>>, vector<128x128xbf16>
    %cst = arith.constant dense<0.000000e+00> : vector<32x128xf32>
    %6 = tpu.matmul %3, %5, %cst {dimension_numbers = #tpu.dot_dimension_numbers<[1], [0], [0], [1], [0, 0, 1, 1], [], []>} : vector<32x128xbf16>, vector<128x128xbf16>, vector<32x128xf32> -> vector<32x128xf32>
    %7 = arith.addf %4, %6 : vector<32x128xf32>
    %c0_6 = arith.constant 0 : index
    %c0_7 = arith.constant 0 : index
    %8 = vector.load %arg7[%c0_6, %c0_7] : memref<32x128xf32, #tpu.memory_space<vmem>>, vector<32x128xf32>
    tpu.vector_store %arg7[%c0_6, %c0_7], %7 {strides = array<i32>} : memref<32x128xf32, #tpu.memory_space<vmem>>, vector<32x128xf32>,
    %c0_i32_8 = arith.constant 0 : i32
    %9 = arith.cmpi eq, %arg2, %c0_i32_8 : i32
    %10 = arith.extui %9 : i1 to i32
    %c0_i32_9 = arith.constant 0 : i32
    %11 = arith.cmpi ne, %10, %c0_i32_9 : i32
    scf.if %11 {
      %c0_10 = arith.constant 0 : index
      %c0_11 = arith.constant 0 : index
      %12 = vector.load %arg7[%c0_10, %c0_11] : memref<32x128xf32, #tpu.memory_space<vmem>>, vector<32x128xf32>
      %c0_12 = arith.constant 0 : index
      %c0_13 = arith.constant 0 : index
      %13 = vector.load %arg5[%c0_12, %c0_13] : memref<1x128xf32, #tpu.memory_space<vmem>>, vector<1x128xf32>
      %14 = vector.broadcast %13 : vector<1x128xf32> to vector<32x128xf32>
      %15 = arith.addf %12, %14 : vector<32x128xf32>
      %cst_14 = arith.constant 0.000000e+00 : f32
      %16 = vector.broadcast %cst_14 : f32 to vector<32x128xf32>
      %17 = arith.maximumf %15, %16 : vector<32x128xf32>
      %c0_15 = arith.constant 0 : index
      %c0_16 = arith.constant 0 : index
      %18 = vector.load %arg6[%c0_15, %c0_16] : memref<32x128xf32, #tpu.memory_space<vmem>>, vector<32x128xf32>
      tpu.vector_store %arg6[%c0_15, %c0_16], %17 {strides = array<i32>} : memref<32x128xf32, #tpu.memory_space<vmem>>, vector<32x128xf32>,
    } else {
    }
    return
  }
  func.func @transform_0(%arg0: i32, %arg1: i32, %arg2: i32) -> (i32, i32) {
    %c0_i32 = arith.constant 0 : i32
    return %arg0, %arg2 : i32, i32
  }
  func.func @transform_1(%arg0: i32, %arg1: i32, %arg2: i32) -> (i32, i32) {
    %c0_i32 = arith.constant 0 : i32
    return %arg2, %arg1 : i32, i32
  }
  func.func @transform_2(%arg0: i32, %arg1: i32, %arg2: i32) -> (i32, i32) {
    %c0_i32 = arith.constant 0 : i32
    %c0_i32_0 = arith.constant 0 : i32
    return %c0_i32, %arg1 : i32, i32
  }
  func.func @transform_3(%arg0: i32, %arg1: i32, %arg2: i32) -> (i32, i32) {
    %c0_i32 = arith.constant 0 : i32
    return %arg0, %arg1 : i32, i32
  }
}

module attributes {stable_mosaic.version = 11 : i64} {
  func.func @_mm_bias_act_kernel(%arg0: i32, %arg1: i32, %arg2: i32, %arg3: memref<16x128xbf16, #tpu.memory_space<vmem>>, %arg4: memref<128x128xbf16, #tpu.memory_space<vmem>>, %arg5: memref<1x128xf32, #tpu.memory_space<vmem>>, %arg6: memref<16x128xf32, #tpu.memory_space<vmem>>, %arg7: memref<16x128xf32, #tpu.memory_space<vmem>>) attributes {dimension_semantics = [#tpu.dimension_semantics<parallel>, #tpu.dimension_semantics<parallel>, #tpu.dimension_semantics<arbitrary>], iteration_bounds = array<i64: 1, 1, 1>, scalar_prefetch = 0 : i64, scratch_operands = 1 : i64, tpu.core_type = #tpu.core_type<tc>, window_params = [{transform_indices = @transform_0, window_bounds = array<i64: 16, 128>}, {transform_indices = @transform_1, window_bounds = array<i64: 128, 128>}, {transform_indices = @transform_2, window_bounds = array<i64: 1, 128>}, {transform_indices = @transform_3, window_bounds = array<i64: 16, 128>}]} {
    %c0_i32 = arith.constant 0 : i32
    %0 = arith.cmpi eq, %arg2, %c0_i32 : i32
    %1 = arith.extui %0 : i1 to i32
    %c0_i32_0 = arith.constant 0 : i32
    %2 = arith.cmpi ne, %1, %c0_i32_0 : i32
    scf.if %2 {
      %cst_10 = arith.constant 0.000000e+00 : f32
      %12 = vector.broadcast %cst_10 : f32 to vector<16x128xf32>
      %c0_11 = arith.constant 0 : index
      %c0_12 = arith.constant 0 : index
      %13 = vector.load %arg7[%c0_11, %c0_12] : memref<16x128xf32, #tpu.memory_space<vmem>>, vector<16x128xf32>
      tpu.vector_store %arg7[%c0_11, %c0_12], %12 {strides = array<i32>} : memref<16x128xf32, #tpu.memory_space<vmem>>, vector<16x128xf32>,
    } else {
    }
    %c0 = arith.constant 0 : index
    %c0_1 = arith.constant 0 : index
    %3 = vector.load %arg3[%c0, %c0_1] : memref<16x128xbf16, #tpu.memory_space<vmem>>, vector<16x128xbf16>
    %c0_2 = arith.constant 0 : index
    %c0_3 = arith.constant 0 : index
    %4 = vector.load %arg7[%c0_2, %c0_3] : memref<16x128xf32, #tpu.memory_space<vmem>>, vector<16x128xf32>
    %c0_4 = arith.constant 0 : index
    %c0_5 = arith.constant 0 : index
    %5 = vector.load %arg4[%c0_4, %c0_5] : memref<128x128xbf16, #tpu.memory_space<vmem>>, vector<128x128xbf16>
    %cst = arith.constant dense<0.000000e+00> : vector<16x128xf32>
    %6 = tpu.matmul %3, %5, %cst {dimension_numbers = #tpu.dot_dimension_numbers<[1], [0], [0], [1], [0, 0, 1, 1], [], []>} : vector<16x128xbf16>, vector<128x128xbf16>, vector<16x128xf32> -> vector<16x128xf32>
    %7 = arith.addf %4, %6 : vector<16x128xf32>
    %c0_6 = arith.constant 0 : index
    %c0_7 = arith.constant 0 : index
    %8 = vector.load %arg7[%c0_6, %c0_7] : memref<16x128xf32, #tpu.memory_space<vmem>>, vector<16x128xf32>
    tpu.vector_store %arg7[%c0_6, %c0_7], %7 {strides = array<i32>} : memref<16x128xf32, #tpu.memory_space<vmem>>, vector<16x128xf32>,
    %c0_i32_8 = arith.constant 0 : i32
    %9 = arith.cmpi eq, %arg2, %c0_i32_8 : i32
    %10 = arith.extui %9 : i1 to i32
    %c0_i32_9 = arith.constant 0 : i32
    %11 = arith.cmpi ne, %10, %c0_i32_9 : i32
    scf.if %11 {
      %c0_10 = arith.constant 0 : index
      %c0_11 = arith.constant 0 : index
      %12 = vector.load %arg7[%c0_10, %c0_11] : memref<16x128xf32, #tpu.memory_space<vmem>>, vector<16x128xf32>
      %c0_12 = arith.constant 0 : index
      %c0_13 = arith.constant 0 : index
      %13 = vector.load %arg5[%c0_12, %c0_13] : memref<1x128xf32, #tpu.memory_space<vmem>>, vector<1x128xf32>
      %14 = vector.broadcast %13 : vector<1x128xf32> to vector<16x128xf32>
      %15 = arith.addf %12, %14 : vector<16x128xf32>
      %c0_14 = arith.constant 0 : index
      %c0_15 = arith.constant 0 : index
      %16 = vector.load %arg6[%c0_14, %c0_15] : memref<16x128xf32, #tpu.memory_space<vmem>>, vector<16x128xf32>
      tpu.vector_store %arg6[%c0_14, %c0_15], %15 {strides = array<i32>} : memref<16x128xf32, #tpu.memory_space<vmem>>, vector<16x128xf32>,
    } else {
    }
    return
  }
  func.func @transform_0(%arg0: i32, %arg1: i32, %arg2: i32) -> (i32, i32) {
    %c0_i32 = arith.constant 0 : i32
    return %arg0, %arg2 : i32, i32
  }
  func.func @transform_1(%arg0: i32, %arg1: i32, %arg2: i32) -> (i32, i32) {
    %c0_i32 = arith.constant 0 : i32
    return %arg2, %arg1 : i32, i32
  }
  func.func @transform_2(%arg0: i32, %arg1: i32, %arg2: i32) -> (i32, i32) {
    %c0_i32 = arith.constant 0 : i32
    %c0_i32_0 = arith.constant 0 : i32
    return %c0_i32, %arg1 : i32, i32
  }
  func.func @transform_3(%arg0: i32, %arg1: i32, %arg2: i32) -> (i32, i32) {
    %c0_i32 = arith.constant 0 : i32
    return %arg0, %arg1 : i32, i32
  }
}

module attributes {stable_mosaic.version = 11 : i64} {
  func.func @_mm_bias_act_kernel(%arg0: i32, %arg1: i32, %arg2: i32, %arg3: memref<16x128xbf16, #tpu.memory_space<vmem>>, %arg4: memref<128x128xbf16, #tpu.memory_space<vmem>>, %arg5: memref<1x128xf32, #tpu.memory_space<vmem>>, %arg6: memref<16x128xf32, #tpu.memory_space<vmem>>, %arg7: memref<16x128xf32, #tpu.memory_space<vmem>>) attributes {dimension_semantics = [#tpu.dimension_semantics<parallel>, #tpu.dimension_semantics<parallel>, #tpu.dimension_semantics<arbitrary>], iteration_bounds = array<i64: 1, 1, 1>, scalar_prefetch = 0 : i64, scratch_operands = 1 : i64, tpu.core_type = #tpu.core_type<tc>, window_params = [{transform_indices = @transform_0, window_bounds = array<i64: 16, 128>}, {transform_indices = @transform_1, window_bounds = array<i64: 128, 128>}, {transform_indices = @transform_2, window_bounds = array<i64: 1, 128>}, {transform_indices = @transform_3, window_bounds = array<i64: 16, 128>}]} {
    %c0_i32 = arith.constant 0 : i32
    %0 = arith.cmpi eq, %arg2, %c0_i32 : i32
    %1 = arith.extui %0 : i1 to i32
    %c0_i32_0 = arith.constant 0 : i32
    %2 = arith.cmpi ne, %1, %c0_i32_0 : i32
    scf.if %2 {
      %cst_11 = arith.constant 0.000000e+00 : f32
      %14 = vector.broadcast %cst_11 : f32 to vector<16x128xf32>
      %c0_12 = arith.constant 0 : index
      %c0_13 = arith.constant 0 : index
      %15 = vector.load %arg7[%c0_12, %c0_13] : memref<16x128xf32, #tpu.memory_space<vmem>>, vector<16x128xf32>
      tpu.vector_store %arg7[%c0_12, %c0_13], %14 {strides = array<i32>} : memref<16x128xf32, #tpu.memory_space<vmem>>, vector<16x128xf32>,
    } else {
    }
    %c0 = arith.constant 0 : index
    %c0_1 = arith.constant 0 : index
    %3 = vector.load %arg3[%c0, %c0_1] : memref<16x128xbf16, #tpu.memory_space<vmem>>, vector<16x128xbf16>
    %cst = arith.constant 0.000000e+00 : bf16
    %4 = vector.broadcast %cst : bf16 to vector<16x128xbf16>
    %5 = arith.maximumf %3, %4 : vector<16x128xbf16>
    %c0_2 = arith.constant 0 : index
    %c0_3 = arith.constant 0 : index
    %6 = vector.load %arg7[%c0_2, %c0_3] : memref<16x128xf32, #tpu.memory_space<vmem>>, vector<16x128xf32>
    %c0_4 = arith.constant 0 : index
    %c0_5 = arith.constant 0 : index
    %7 = vector.load %arg4[%c0_4, %c0_5] : memref<128x128xbf16, #tpu.memory_space<vmem>>, vector<128x128xbf16>
    %cst_6 = arith.constant dense<0.000000e+00> : vector<16x128xf32>
    %8 = tpu.matmul %5, %7, %cst_6 {dimension_numbers = #tpu.dot_dimension_numbers<[1], [0], [0], [1], [0, 0, 1, 1], [], []>} : vector<16x128xbf16>, vector<128x128xbf16>, vector<16x128xf32> -> vector<16x128xf32>
    %9 = arith.addf %6, %8 : vector<16x128xf32>
    %c0_7 = arith.constant 0 : index
    %c0_8 = arith.constant 0 : index
    %10 = vector.load %arg7[%c0_7, %c0_8] : memref<16x128xf32, #tpu.memory_space<vmem>>, vector<16x128xf32>
    tpu.vector_store %arg7[%c0_7, %c0_8], %9 {strides = array<i32>} : memref<16x128xf32, #tpu.memory_space<vmem>>, vector<16x128xf32>,
    %c0_i32_9 = arith.constant 0 : i32
    %11 = arith.cmpi eq, %arg2, %c0_i32_9 : i32
    %12 = arith.extui %11 : i1 to i32
    %c0_i32_10 = arith.constant 0 : i32
    %13 = arith.cmpi ne, %12, %c0_i32_10 : i32
    scf.if %13 {
      %c0_11 = arith.constant 0 : index
      %c0_12 = arith.constant 0 : index
      %14 = vector.load %arg7[%c0_11, %c0_12] : memref<16x128xf32, #tpu.memory_space<vmem>>, vector<16x128xf32>
      %c0_13 = arith.constant 0 : index
      %c0_14 = arith.constant 0 : index
      %15 = vector.load %arg5[%c0_13, %c0_14] : memref<1x128xf32, #tpu.memory_space<vmem>>, vector<1x128xf32>
      %16 = vector.broadcast %15 : vector<1x128xf32> to vector<16x128xf32>
      %17 = arith.addf %14, %16 : vector<16x128xf32>
      %cst_15 = arith.constant 0.000000e+00 : f32
      %18 = vector.broadcast %cst_15 : f32 to vector<16x128xf32>
      %19 = arith.maximumf %17, %18 : vector<16x128xf32>
      %c0_16 = arith.constant 0 : index
      %c0_17 = arith.constant 0 : index
      %20 = vector.load %arg6[%c0_16, %c0_17] : memref<16x128xf32, #tpu.memory_space<vmem>>, vector<16x128xf32>
      tpu.vector_store %arg6[%c0_16, %c0_17], %19 {strides = array<i32>} : memref<16x128xf32, #tpu.memory_space<vmem>>, vector<16x128xf32>,
    } else {
    }
    return
  }
  func.func @transform_0(%arg0: i32, %arg1: i32, %arg2: i32) -> (i32, i32) {
    %c0_i32 = arith.constant 0 : i32
    return %arg0, %arg2 : i32, i32
  }
  func.func @transform_1(%arg0: i32, %arg1: i32, %arg2: i32) -> (i32, i32) {
    %c0_i32 = arith.constant 0 : i32
    return %arg2, %arg1 : i32, i32
  }
  func.func @transform_2(%arg0: i32, %arg1: i32, %arg2: i32) -> (i32, i32) {
    %c0_i32 = arith.constant 0 : i32
    %c0_i32_0 = arith.constant 0 : i32
    return %c0_i32, %arg1 : i32, i32
  }
  func.func @transform_3(%arg0: i32, %arg1: i32, %arg2: i32) -> (i32, i32) {
    %c0_i32 = arith.constant 0 : i32
    return %arg0, %arg1 : i32, i32
  }
}

module attributes {stable_mosaic.version = 11 : i64} {
  func.func @_mm_bias_act_kernel(%arg0: i32, %arg1: i32, %arg2: i32, %arg3: memref<16x128xbf16, #tpu.memory_space<vmem>>, %arg4: memref<128x128xbf16, #tpu.memory_space<vmem>>, %arg5: memref<1x128xf32, #tpu.memory_space<vmem>>, %arg6: memref<16x128xf32, #tpu.memory_space<vmem>>, %arg7: memref<16x128xf32, #tpu.memory_space<vmem>>, %arg8: memref<16x128xf32, #tpu.memory_space<vmem>>) attributes {dimension_semantics = [#tpu.dimension_semantics<parallel>, #tpu.dimension_semantics<parallel>, #tpu.dimension_semantics<arbitrary>], iteration_bounds = array<i64: 1, 1, 1>, scalar_prefetch = 0 : i64, scratch_operands = 1 : i64, tpu.core_type = #tpu.core_type<tc>, window_params = [{transform_indices = @transform_0, window_bounds = array<i64: 16, 128>}, {transform_indices = @transform_1, window_bounds = array<i64: 128, 128>}, {transform_indices = @transform_2, window_bounds = array<i64: 1, 128>}, {transform_indices = @transform_3, window_bounds = array<i64: 16, 128>}, {transform_indices = @transform_4, window_bounds = array<i64: 16, 128>}]} {
    %c0_i32 = arith.constant 0 : i32
    %0 = arith.cmpi eq, %arg2, %c0_i32 : i32
    %1 = arith.extui %0 : i1 to i32
    %c0_i32_0 = arith.constant 0 : i32
    %2 = arith.cmpi ne, %1, %c0_i32_0 : i32
    scf.if %2 {
      %cst_10 = arith.constant 0.000000e+00 : f32
      %12 = vector.broadcast %cst_10 : f32 to vector<16x128xf32>
      %c0_11 = arith.constant 0 : index
      %c0_12 = arith.constant 0 : index
      %13 = vector.load %arg8[%c0_11, %c0_12] : memref<16x128xf32, #tpu.memory_space<vmem>>, vector<16x128xf32>
      tpu.vector_store %arg8[%c0_11, %c0_12], %12 {strides = array<i32>} : memref<16x128xf32, #tpu.memory_space<vmem>>, vector<16x128xf32>,
    } else {
    }
    %c0 = arith.constant 0 : index
    %c0_1 = arith.constant 0 : index
    %3 = vector.load %arg3[%c0, %c0_1] : memref<16x128xbf16, #tpu.memory_space<vmem>>, vector<16x128xbf16>
    %c0_2 = arith.constant 0 : index
    %c0_3 = arith.constant 0 : index
    %4 = vector.load %arg8[%c0_2, %c0_3] : memref<16x128xf32, #tpu.memory_space<vmem>>, vector<16x128xf32>
    %c0_4 = arith.constant 0 : index
    %c0_5 = arith.constant 0 : index
    %5 = vector.load %arg4[%c0_4, %c0_5] : memref<128x128xbf16, #tpu.memory_space<vmem>>, vector<128x128xbf16>
    %cst = arith.constant dense<0.000000e+00> : vector<16x128xf32>
    %6 = tpu.matmul %3, %5, %cst {dimension_numbers = #tpu.dot_dimension_numbers<[1], [0], [0], [1], [0, 0, 1, 1], [], []>} : vector<16x128xbf16>, vector<128x128xbf16>, vector<16x128xf32> -> vector<16x128xf32>
    %7 = arith.addf %4, %6 : vector<16x128xf32>
    %c0_6 = arith.constant 0 : index
    %c0_7 = arith.constant 0 : index
    %8 = vector.load %arg8[%c0_6, %c0_7] : memref<16x128xf32, #tpu.memory_space<vmem>>, vector<16x128xf32>
    tpu.vector_store %arg8[%c0_6, %c0_7], %7 {strides = array<i32>} : memref<16x128xf32, #tpu.memory_space<vmem>>, vector<16x128xf32>,
    %c0_i32_8 = arith.constant 0 : i32
    %9 = arith.cmpi eq, %arg2, %c0_i32_8 : i32
    %10 = arith.extui %9 : i1 to i32
    %c0_i32_9 = arith.constant 0 : i32
    %11 = arith.cmpi ne, %10, %c0_i32_9 : i32
    scf.if %11 {
      %c0_10 = arith.constant 0 : index
      %c0_11 = arith.constant 0 : index
      %12 = vector.load %arg8[%c0_10, %c0_11] : memref<16x128xf32, #tpu.memory_space<vmem>>, vector<16x128xf32>
      %c0_12 = arith.constant 0 : index
      %c0_13 = arith.constant 0 : index
      %13 = vector.load %arg5[%c0_12, %c0_13] : memref<1x128xf32, #tpu.memory_space<vmem>>, vector<1x128xf32>
      %14 = vector.broadcast %13 : vector<1x128xf32> to vector<16x128xf32>
      %15 = arith.addf %12, %14 : vector<16x128xf32>
      %c0_14 = arith.constant 0 : index
      %c0_15 = arith.constant 0 : index
      %16 = vector.load %arg6[%c0_14, %c0_15] : memref<16x128xf32, #tpu.memory_space<vmem>>, vector<16x128xf32>
      %17 = arith.addf %15, %16 : vector<16x128xf32>
      %c0_16 = arith.constant 0 : index
      %c0_17 = arith.constant 0 : index
      %18 = vector.load %arg7[%c0_16, %c0_17] : memref<16x128xf32, #tpu.memory_space<vmem>>, vector<16x128xf32>
      tpu.vector_store %arg7[%c0_16, %c0_17], %17 {strides = array<i32>} : memref<16x128xf32, #tpu.memory_space<vmem>>, vector<16x128xf32>,
    } else {
    }
    return
  }
  func.func @transform_0(%arg0: i32, %arg1: i32, %arg2: i32) -> (i32, i32) {
    %c0_i32 = arith.constant 0 : i32
    return %arg0, %arg2 : i32, i32
  }
  func.func @transform_1(%arg0: i32, %arg1: i32, %arg2: i32) -> (i32, i32) {
    %c0_i32 = arith.constant 0 : i32
    return %arg2, %arg1 : i32, i32
  }
  func.func @transform_2(%arg0: i32, %arg1: i32, %arg2: i32) -> (i32, i32) {
    %c0_i32 = arith.constant 0 : i32
    %c0_i32_0 = arith.constant 0 : i32
    return %c0_i32, %arg1 : i32, i32
  }
  func.func @transform_3(%arg0: i32, %arg1: i32, %arg2: i32) -> (i32, i32) {
    %c0_i32 = arith.constant 0 : i32
    return %arg0, %arg1 : i32, i32
  }
  func.func @transform_4(%arg0: i32, %arg1: i32, %arg2: i32) -> (i32, i32) {
    %c0_i32 = arith.constant 0 : i32
    return %arg0, %arg1 : i32, i32
  }
}

module attributes {stable_mosaic.version = 11 : i64} {
  func.func @_mm_bias_act_kernel(%arg0: i32, %arg1: i32, %arg2: i32, %arg3: memref<8x128xbf16, #tpu.memory_space<vmem>>, %arg4: memref<128x128xbf16, #tpu.memory_space<vmem>>, %arg5: memref<1x128xf32, #tpu.memory_space<vmem>>, %arg6: memref<8x128xf32, #tpu.memory_space<vmem>>, %arg7: memref<8x128xf32, #tpu.memory_space<vmem>>) attributes {dimension_semantics = [#tpu.dimension_semantics<parallel>, #tpu.dimension_semantics<parallel>, #tpu.dimension_semantics<arbitrary>], iteration_bounds = array<i64: 1, 1, 1>, scalar_prefetch = 0 : i64, scratch_operands = 1 : i64, tpu.core_type = #tpu.core_type<tc>, window_params = [{transform_indices = @transform_0, window_bounds = array<i64: 8, 128>}, {transform_indices = @transform_1, window_bounds = array<i64: 128, 128>}, {transform_indices = @transform_2, window_bounds = array<i64: 1, 128>}, {transform_indices = @transform_3, window_bounds = array<i64: 8, 128>}]} {
    %c0_i32 = arith.constant 0 : i32
    %0 = arith.cmpi eq, %arg2, %c0_i32 : i32
    %1 = arith.extui %0 : i1 to i32
    %c0_i32_0 = arith.constant 0 : i32
    %2 = arith.cmpi ne, %1, %c0_i32_0 : i32
    scf.if %2 {
      %cst_10 = arith.constant 0.000000e+00 : f32
      %12 = vector.broadcast %cst_10 : f32 to vector<8x128xf32>
      %c0_11 = arith.constant 0 : index
      %c0_12 = arith.constant 0 : index
      %13 = vector.load %arg7[%c0_11, %c0_12] : memref<8x128xf32, #tpu.memory_space<vmem>>, vector<8x128xf32>
      tpu.vector_store %arg7[%c0_11, %c0_12], %12 {strides = array<i32>} : memref<8x128xf32, #tpu.memory_space<vmem>>, vector<8x128xf32>,
    } else {
    }
    %c0 = arith.constant 0 : index
    %c0_1 = arith.constant 0 : index
    %3 = vector.load %arg3[%c0, %c0_1] : memref<8x128xbf16, #tpu.memory_space<vmem>>, vector<8x128xbf16>
    %c0_2 = arith.constant 0 : index
    %c0_3 = arith.constant 0 : index
    %4 = vector.load %arg7[%c0_2, %c0_3] : memref<8x128xf32, #tpu.memory_space<vmem>>, vector<8x128xf32>
    %c0_4 = arith.constant 0 : index
    %c0_5 = arith.constant 0 : index
    %5 = vector.load %arg4[%c0_4, %c0_5] : memref<128x128xbf16, #tpu.memory_space<vmem>>, vector<128x128xbf16>
    %cst = arith.constant dense<0.000000e+00> : vector<8x128xf32>
    %6 = tpu.matmul %3, %5, %cst {dimension_numbers = #tpu.dot_dimension_numbers<[1], [0], [0], [1], [0, 0, 1, 1], [], []>} : vector<8x128xbf16>, vector<128x128xbf16>, vector<8x128xf32> -> vector<8x128xf32>
    %7 = arith.addf %4, %6 : vector<8x128xf32>
    %c0_6 = arith.constant 0 : index
    %c0_7 = arith.constant 0 : index
    %8 = vector.load %arg7[%c0_6, %c0_7] : memref<8x128xf32, #tpu.memory_space<vmem>>, vector<8x128xf32>
    tpu.vector_store %arg7[%c0_6, %c0_7], %7 {strides = array<i32>} : memref<8x128xf32, #tpu.memory_space<vmem>>, vector<8x128xf32>,
    %c0_i32_8 = arith.constant 0 : i32
    %9 = arith.cmpi eq, %arg2, %c0_i32_8 : i32
    %10 = arith.extui %9 : i1 to i32
    %c0_i32_9 = arith.constant 0 : i32
    %11 = arith.cmpi ne, %10, %c0_i32_9 : i32
    scf.if %11 {
      %c0_10 = arith.constant 0 : index
      %c0_11 = arith.constant 0 : index
      %12 = vector.load %arg7[%c0_10, %c0_11] : memref<8x128xf32, #tpu.memory_space<vmem>>, vector<8x128xf32>
      %c0_12 = arith.constant 0 : index
      %c0_13 = arith.constant 0 : index
      %13 = vector.load %arg5[%c0_12, %c0_13] : memref<1x128xf32, #tpu.memory_space<vmem>>, vector<1x128xf32>
      %14 = vector.broadcast %13 : vector<1x128xf32> to vector<8x128xf32>
      %15 = arith.addf %12, %14 : vector<8x128xf32>
      %c0_14 = arith.constant 0 : index
      %c0_15 = arith.constant 0 : index
      %16 = vector.load %arg6[%c0_14, %c0_15] : memref<8x128xf32, #tpu.memory_space<vmem>>, vector<8x128xf32>
      tpu.vector_store %arg6[%c0_14, %c0_15], %15 {strides = array<i32>} : memref<8x128xf32, #tpu.memory_space<vmem>>, vector<8x128xf32>,
    } else {
    }
    return
  }
  func.func @transform_0(%arg0: i32, %arg1: i32, %arg2: i32) -> (i32, i32) {
    %c0_i32 = arith.constant 0 : i32
    return %arg0, %arg2 : i32, i32
  }
  func.func @transform_1(%arg0: i32, %arg1: i32, %arg2: i32) -> (i32, i32) {
    %c0_i32 = arith.constant 0 : i32
    return %arg2, %arg1 : i32, i32
  }
  func.func @transform_2(%arg0: i32, %arg1: i32, %arg2: i32) -> (i32, i32) {
    %c0_i32 = arith.constant 0 : i32
    %c0_i32_0 = arith.constant 0 : i32
    return %c0_i32, %arg1 : i32, i32
  }
  func.func @transform_3(%arg0: i32, %arg1: i32, %arg2: i32) -> (i32, i32) {
    %c0_i32 = arith.constant 0 : i32
    return %arg0, %arg1 : i32, i32
  }
}

module attributes {stable_mosaic.version = 11 : i64} {
  func.func @_mm_bias_act_kernel(%arg0: i32, %arg1: i32, %arg2: i32, %arg3: memref<8x128xbf16, #tpu.memory_space<vmem>>, %arg4: memref<128x128xbf16, #tpu.memory_space<vmem>>, %arg5: memref<1x128xf32, #tpu.memory_space<vmem>>, %arg6: memref<8x128xf32, #tpu.memory_space<vmem>>, %arg7: memref<8x128xf32, #tpu.memory_space<vmem>>, %arg8: memref<8x128xf32, #tpu.memory_space<vmem>>) attributes {dimension_semantics = [#tpu.dimension_semantics<parallel>, #tpu.dimension_semantics<parallel>, #tpu.dimension_semantics<arbitrary>], iteration_bounds = array<i64: 1, 1, 1>, scalar_prefetch = 0 : i64, scratch_operands = 1 : i64, tpu.core_type = #tpu.core_type<tc>, window_params = [{transform_indices = @transform_0, window_bounds = array<i64: 8, 128>}, {transform_indices = @transform_1, window_bounds = array<i64: 128, 128>}, {transform_indices = @transform_2, window_bounds = array<i64: 1, 128>}, {transform_indices = @transform_3, window_bounds = array<i64: 8, 128>}, {transform_indices = @transform_4, window_bounds = array<i64: 8, 128>}]} {
    %c0_i32 = arith.constant 0 : i32
    %0 = arith.cmpi eq, %arg2, %c0_i32 : i32
    %1 = arith.extui %0 : i1 to i32
    %c0_i32_0 = arith.constant 0 : i32
    %2 = arith.cmpi ne, %1, %c0_i32_0 : i32
    scf.if %2 {
      %cst_10 = arith.constant 0.000000e+00 : f32
      %12 = vector.broadcast %cst_10 : f32 to vector<8x128xf32>
      %c0_11 = arith.constant 0 : index
      %c0_12 = arith.constant 0 : index
      %13 = vector.load %arg8[%c0_11, %c0_12] : memref<8x128xf32, #tpu.memory_space<vmem>>, vector<8x128xf32>
      tpu.vector_store %arg8[%c0_11, %c0_12], %12 {strides = array<i32>} : memref<8x128xf32, #tpu.memory_space<vmem>>, vector<8x128xf32>,
    } else {
    }
    %c0 = arith.constant 0 : index
    %c0_1 = arith.constant 0 : index
    %3 = vector.load %arg3[%c0, %c0_1] : memref<8x128xbf16, #tpu.memory_space<vmem>>, vector<8x128xbf16>
    %c0_2 = arith.constant 0 : index
    %c0_3 = arith.constant 0 : index
    %4 = vector.load %arg8[%c0_2, %c0_3] : memref<8x128xf32, #tpu.memory_space<vmem>>, vector<8x128xf32>
    %c0_4 = arith.constant 0 : index
    %c0_5 = arith.constant 0 : index
    %5 = vector.load %arg4[%c0_4, %c0_5] : memref<128x128xbf16, #tpu.memory_space<vmem>>, vector<128x128xbf16>
    %cst = arith.constant dense<0.000000e+00> : vector<8x128xf32>
    %6 = tpu.matmul %3, %5, %cst {dimension_numbers = #tpu.dot_dimension_numbers<[1], [0], [0], [1], [0, 0, 1, 1], [], []>} : vector<8x128xbf16>, vector<128x128xbf16>, vector<8x128xf32> -> vector<8x128xf32>
    %7 = arith.addf %4, %6 : vector<8x128xf32>
    %c0_6 = arith.constant 0 : index
    %c0_7 = arith.constant 0 : index
    %8 = vector.load %arg8[%c0_6, %c0_7] : memref<8x128xf32, #tpu.memory_space<vmem>>, vector<8x128xf32>
    tpu.vector_store %arg8[%c0_6, %c0_7], %7 {strides = array<i32>} : memref<8x128xf32, #tpu.memory_space<vmem>>, vector<8x128xf32>,
    %c0_i32_8 = arith.constant 0 : i32
    %9 = arith.cmpi eq, %arg2, %c0_i32_8 : i32
    %10 = arith.extui %9 : i1 to i32
    %c0_i32_9 = arith.constant 0 : i32
    %11 = arith.cmpi ne, %10, %c0_i32_9 : i32
    scf.if %11 {
      %c0_10 = arith.constant 0 : index
      %c0_11 = arith.constant 0 : index
      %12 = vector.load %arg8[%c0_10, %c0_11] : memref<8x128xf32, #tpu.memory_space<vmem>>, vector<8x128xf32>
      %c0_12 = arith.constant 0 : index
      %c0_13 = arith.constant 0 : index
      %13 = vector.load %arg5[%c0_12, %c0_13] : memref<1x128xf32, #tpu.memory_space<vmem>>, vector<1x128xf32>
      %14 = vector.broadcast %13 : vector<1x128xf32> to vector<8x128xf32>
      %15 = arith.addf %12, %14 : vector<8x128xf32>
      %c0_14 = arith.constant 0 : index
      %c0_15 = arith.constant 0 : index
      %16 = vector.load %arg6[%c0_14, %c0_15] : memref<8x128xf32, #tpu.memory_space<vmem>>, vector<8x128xf32>
      %17 = arith.addf %15, %16 : vector<8x128xf32>
      %c0_16 = arith.constant 0 : index
      %c0_17 = arith.constant 0 : index
      %18 = vector.load %arg7[%c0_16, %c0_17] : memref<8x128xf32, #tpu.memory_space<vmem>>, vector<8x128xf32>
      tpu.vector_store %arg7[%c0_16, %c0_17], %17 {strides = array<i32>} : memref<8x128xf32, #tpu.memory_space<vmem>>, vector<8x128xf32>,
    } else {
    }
    return
  }
  func.func @transform_0(%arg0: i32, %arg1: i32, %arg2: i32) -> (i32, i32) {
    %c0_i32 = arith.constant 0 : i32
    return %arg0, %arg2 : i32, i32
  }
  func.func @transform_1(%arg0: i32, %arg1: i32, %arg2: i32) -> (i32, i32) {
    %c0_i32 = arith.constant 0 : i32
    return %arg2, %arg1 : i32, i32
  }
  func.func @transform_2(%arg0: i32, %arg1: i32, %arg2: i32) -> (i32, i32) {
    %c0_i32 = arith.constant 0 : i32
    %c0_i32_0 = arith.constant 0 : i32
    return %c0_i32, %arg1 : i32, i32
  }
  func.func @transform_3(%arg0: i32, %arg1: i32, %arg2: i32) -> (i32, i32) {
    %c0_i32 = arith.constant 0 : i32
    return %arg0, %arg1 : i32, i32
  }
  func.func @transform_4(%arg0: i32, %arg1: i32, %arg2: i32) -> (i32, i32) {
    %c0_i32 = arith.constant 0 : i32
    return %arg0, %arg1 : i32, i32
  }
}

module attributes {stable_mosaic.version = 11 : i64} {
  func.func @_mm_bias_act_kernel(%arg0: i32, %arg1: i32, %arg2: i32, %arg3: memref<8x128xbf16, #tpu.memory_space<vmem>>, %arg4: memref<128x128xbf16, #tpu.memory_space<vmem>>, %arg5: memref<1x128xf32, #tpu.memory_space<vmem>>, %arg6: memref<8x128xf32, #tpu.memory_space<vmem>>, %arg7: memref<8x128xf32, #tpu.memory_space<vmem>>) attributes {dimension_semantics = [#tpu.dimension_semantics<parallel>, #tpu.dimension_semantics<parallel>, #tpu.dimension_semantics<arbitrary>], iteration_bounds = array<i64: 1, 1, 1>, scalar_prefetch = 0 : i64, scratch_operands = 1 : i64, tpu.core_type = #tpu.core_type<tc>, window_params = [{transform_indices = @transform_0, window_bounds = array<i64: 8, 128>}, {transform_indices = @transform_1, window_bounds = array<i64: 128, 128>}, {transform_indices = @transform_2, window_bounds = array<i64: 1, 128>}, {transform_indices = @transform_3, window_bounds = array<i64: 8, 128>}]} {
    %c0_i32 = arith.constant 0 : i32
    %0 = arith.cmpi eq, %arg2, %c0_i32 : i32
    %1 = arith.extui %0 : i1 to i32
    %c0_i32_0 = arith.constant 0 : i32
    %2 = arith.cmpi ne, %1, %c0_i32_0 : i32
    scf.if %2 {
      %cst_11 = arith.constant 0.000000e+00 : f32
      %14 = vector.broadcast %cst_11 : f32 to vector<8x128xf32>
      %c0_12 = arith.constant 0 : index
      %c0_13 = arith.constant 0 : index
      %15 = vector.load %arg7[%c0_12, %c0_13] : memref<8x128xf32, #tpu.memory_space<vmem>>, vector<8x128xf32>
      tpu.vector_store %arg7[%c0_12, %c0_13], %14 {strides = array<i32>} : memref<8x128xf32, #tpu.memory_space<vmem>>, vector<8x128xf32>,
    } else {
    }
    %c0 = arith.constant 0 : index
    %c0_1 = arith.constant 0 : index
    %3 = vector.load %arg3[%c0, %c0_1] : memref<8x128xbf16, #tpu.memory_space<vmem>>, vector<8x128xbf16>
    %cst = arith.constant 0.000000e+00 : bf16
    %4 = vector.broadcast %cst : bf16 to vector<8x128xbf16>
    %5 = arith.maximumf %3, %4 : vector<8x128xbf16>
    %c0_2 = arith.constant 0 : index
    %c0_3 = arith.constant 0 : index
    %6 = vector.load %arg7[%c0_2, %c0_3] : memref<8x128xf32, #tpu.memory_space<vmem>>, vector<8x128xf32>
    %c0_4 = arith.constant 0 : index
    %c0_5 = arith.constant 0 : index
    %7 = vector.load %arg4[%c0_4, %c0_5] : memref<128x128xbf16, #tpu.memory_space<vmem>>, vector<128x128xbf16>
    %cst_6 = arith.constant dense<0.000000e+00> : vector<8x128xf32>
    %8 = tpu.matmul %5, %7, %cst_6 {dimension_numbers = #tpu.dot_dimension_numbers<[1], [0], [0], [1], [0, 0, 1, 1], [], []>} : vector<8x128xbf16>, vector<128x128xbf16>, vector<8x128xf32> -> vector<8x128xf32>
    %9 = arith.addf %6, %8 : vector<8x128xf32>
    %c0_7 = arith.constant 0 : index
    %c0_8 = arith.constant 0 : index
    %10 = vector.load %arg7[%c0_7, %c0_8] : memref<8x128xf32, #tpu.memory_space<vmem>>, vector<8x128xf32>
    tpu.vector_store %arg7[%c0_7, %c0_8], %9 {strides = array<i32>} : memref<8x128xf32, #tpu.memory_space<vmem>>, vector<8x128xf32>,
    %c0_i32_9 = arith.constant 0 : i32
    %11 = arith.cmpi eq, %arg2, %c0_i32_9 : i32
    %12 = arith.extui %11 : i1 to i32
    %c0_i32_10 = arith.constant 0 : i32
    %13 = arith.cmpi ne, %12, %c0_i32_10 : i32
    scf.if %13 {
      %c0_11 = arith.constant 0 : index
      %c0_12 = arith.constant 0 : index
      %14 = vector.load %arg7[%c0_11, %c0_12] : memref<8x128xf32, #tpu.memory_space<vmem>>, vector<8x128xf32>
      %c0_13 = arith.constant 0 : index
      %c0_14 = arith.constant 0 : index
      %15 = vector.load %arg5[%c0_13, %c0_14] : memref<1x128xf32, #tpu.memory_space<vmem>>, vector<1x128xf32>
      %16 = vector.broadcast %15 : vector<1x128xf32> to vector<8x128xf32>
      %17 = arith.addf %14, %16 : vector<8x128xf32>
      %cst_15 = arith.constant 0.000000e+00 : f32
      %18 = vector.broadcast %cst_15 : f32 to vector<8x128xf32>
      %19 = arith.maximumf %17, %18 : vector<8x128xf32>
      %c0_16 = arith.constant 0 : index
      %c0_17 = arith.constant 0 : index
      %20 = vector.load %arg6[%c0_16, %c0_17] : memref<8x128xf32, #tpu.memory_space<vmem>>, vector<8x128xf32>
      tpu.vector_store %arg6[%c0_16, %c0_17], %19 {strides = array<i32>} : memref<8x128xf32, #tpu.memory_space<vmem>>, vector<8x128xf32>,
    } else {
    }
    return
  }
  func.func @transform_0(%arg0: i32, %arg1: i32, %arg2: i32) -> (i32, i32) {
    %c0_i32 = arith.constant 0 : i32
    return %arg0, %arg2 : i32, i32
  }
  func.func @transform_1(%arg0: i32, %arg1: i32, %arg2: i32) -> (i32, i32) {
    %c0_i32 = arith.constant 0 : i32
    return %arg2, %arg1 : i32, i32
  }
  func.func @transform_2(%arg0: i32, %arg1: i32, %arg2: i32) -> (i32, i32) {
    %c0_i32 = arith.constant 0 : i32
    %c0_i32_0 = arith.constant 0 : i32
    return %c0_i32, %arg1 : i32, i32
  }
  func.func @transform_3(%arg0: i32, %arg1: i32, %arg2: i32) -> (i32, i32) {
    %c0_i32 = arith.constant 0 : i32
    return %arg0, %arg1 : i32, i32
  }
}

module attributes {stable_mosaic.version = 11 : i64} {
  func.func @_quantize_kernel(%arg0: i32, %arg1: memref<8x128xf32, #tpu.memory_space<vmem>>, %arg2: memref<128x128xf32, #tpu.memory_space<vmem>>, %arg3: memref<1x128xf32, #tpu.memory_space<vmem>>, %arg4: memref<8x128xf32, #tpu.memory_space<vmem>>, %arg5: memref<1x128xf32, #tpu.memory_space<vmem>>, %arg6: memref<1x1xf32, #tpu.memory_space<vmem>>) attributes {dimension_semantics = [#tpu.dimension_semantics<arbitrary>], iteration_bounds = array<i64: 1>, scalar_prefetch = 0 : i64, scratch_operands = 0 : i64, tpu.core_type = #tpu.core_type<tc>, window_params = [{transform_indices = @transform_0, window_bounds = array<i64: 8, 128>}, {pipeline_mode = #tpu.pipeline_mode<synchronous>, transform_indices = @transform_1, window_bounds = array<i64: 128, 128>}, {pipeline_mode = #tpu.pipeline_mode<synchronous>, transform_indices = @transform_2, window_bounds = array<i64: 1, 128>}, {transform_indices = @transform_3, window_bounds = array<i64: 8, 128>}, {pipeline_mode = #tpu.pipeline_mode<synchronous>, transform_indices = @transform_4, window_bounds = array<i64: 1, 128>}, {pipeline_mode = #tpu.pipeline_mode<synchronous>, transform_indices = @transform_5, window_bounds = array<i64: 1, 1>}]} {
    %c0_i32 = arith.constant 0 : i32
    %0 = arith.cmpi eq, %arg0, %c0_i32 : i32
    %1 = arith.extui %0 : i1 to i32
    %c0_i32_0 = arith.constant 0 : i32
    %2 = arith.cmpi ne, %1, %c0_i32_0 : i32
    scf.if %2 {
      %cst_24 = arith.constant 0.000000e+00 : f32
      %52 = vector.broadcast %cst_24 : f32 to vector<1x128xf32>
      %c0_25 = arith.constant 0 : index
      %c0_26 = arith.constant 0 : index
      %53 = vector.load %arg5[%c0_25, %c0_26] : memref<1x128xf32, #tpu.memory_space<vmem>>, vector<1x128xf32>
      tpu.vector_store %arg5[%c0_25, %c0_26], %52 {strides = array<i32>} : memref<1x128xf32, #tpu.memory_space<vmem>>, vector<1x128xf32>,
      %cst_27 = arith.constant 0.000000e+00 : f32
      %54 = vector.broadcast %cst_27 : f32 to vector<1x1xf32>
      %c0_28 = arith.constant 0 : index
      %c0_29 = arith.constant 0 : index
      %55 = vector.load %arg6[%c0_28, %c0_29] : memref<1x1xf32, #tpu.memory_space<vmem>>, vector<1x1xf32>
      tpu.vector_store %arg6[%c0_28, %c0_29], %54 {strides = array<i32>} : memref<1x1xf32, #tpu.memory_space<vmem>>, vector<1x1xf32>,
    } else {
    }
    %c0 = arith.constant 0 : index
    %c0_1 = arith.constant 0 : index
    %3 = vector.load %arg1[%c0, %c0_1] : memref<8x128xf32, #tpu.memory_space<vmem>>, vector<8x128xf32>
    %c0_2 = arith.constant 0 : index
    %c0_3 = arith.constant 0 : index
    %4 = vector.load %arg2[%c0_2, %c0_3] : memref<128x128xf32, #tpu.memory_space<vmem>>, vector<128x128xf32>
    %cst = arith.constant dense<0.000000e+00> : vector<8x128xf32>
    %5 = tpu.matmul %3, %4, %cst {dimension_numbers = #tpu.dot_dimension_numbers<[1], [0], [0], [1], [0, 0, 1, 1], [], []>} : vector<8x128xf32>, vector<128x128xf32>, vector<8x128xf32> -> vector<8x128xf32>
    %c0_4 = arith.constant 0 : index
    %c0_5 = arith.constant 0 : index
    %6 = vector.load %arg3[%c0_4, %c0_5] : memref<1x128xf32, #tpu.memory_space<vmem>>, vector<1x128xf32>
    %cst_6 = arith.constant 2.000000e+00 : f32
    %7 = vector.broadcast %cst_6 : f32 to vector<8x128xf32>
    %8 = arith.mulf %7, %5 : vector<8x128xf32>
    %9 = vector.broadcast %6 : vector<1x128xf32> to vector<8x128xf32>
    %10 = arith.subf %9, %8 : vector<8x128xf32>
    %cst_7 = arith.constant dense<0x7F800000> : vector<8xf32>
    %11 = vector.multi_reduction <minimumf>, %10, %cst_7 [1] : vector<8x128xf32> to vector<8xf32>
    %12 = vector.shape_cast %11 : vector<8xf32> to vector<8x1xf32>
    %13 = tpu.iota {dimensions = array<i32: 1>} : vector<8x128xi32>
    %14 = vector.broadcast %12 : vector<8x1xf32> to vector<8x128xf32>
    %15 = arith.cmpf ole, %10, %14 : vector<8x128xf32>
    %c128_i32 = arith.constant 128 : i32
    %16 = vector.broadcast %c128_i32 : i32 to vector<8x128xi32>
    %17 = arith.select %15, %13, %16 : vector<8x128xi1>, vector<8x128xi32>
    %cst_8 = arith.constant dense<2147483647> : vector<8xi32>
    %18 = vector.multi_reduction <minsi>, %17, %cst_8 [1] : vector<8x128xi32> to vector<8xi32>
    %19 = vector.shape_cast %18 : vector<8xi32> to vector<8x1xi32>
    %20 = vector.broadcast %19 : vector<8x1xi32> to vector<8x128xi32>
    %21 = arith.cmpi eq, %13, %20 : vector<8x128xi32>
    %22 = arith.extui %21 : vector<8x128xi1> to vector<8x128xi32>
    %23 = arith.sitofp %22 : vector<8x128xi32> to vector<8x128xf32>
    %cst_9 = arith.constant dense<0.000000e+00> : vector<8x128xf32>
    %24 = tpu.matmul %23, %4, %cst_9 {dimension_numbers = #tpu.dot_dimension_numbers<[1], [1], [0], [0], [0, 0, 1, 0], [], []>} : vector<8x128xf32>, vector<128x128xf32>, vector<8x128xf32> -> vector<8x128xf32>
    %c0_10 = arith.constant 0 : index
    %c0_11 = arith.constant 0 : index
    %25 = vector.load %arg4[%c0_10, %c0_11] : memref<8x128xf32, #tpu.memory_space<vmem>>, vector<8x128xf32>
    tpu.vector_store %arg4[%c0_10, %c0_11], %24 {strides = array<i32>} : memref<8x128xf32, #tpu.memory_space<vmem>>, vector<8x128xf32>,
    %c8_i32 = arith.constant 8 : i32
    %26 = arith.muli %arg0, %c8_i32 : i32
    %27 = tpu.iota {dimensions = array<i32: 0>} : vector<8x1xi32>
    %28 = vector.broadcast %26 : i32 to vector<8x1xi32>
    %29 = arith.addi %28, %27 : vector<8x1xi32>
    %c8_i32_12 = arith.constant 8 : i32
    %30 = vector.broadcast %c8_i32_12 : i32 to vector<8x1xi32>
    %31 = arith.cmpi slt, %29, %30 : vector<8x1xi32>
    %32 = arith.extui %31 : vector<8x1xi1> to vector<8x1xi32>
    %33 = arith.sitofp %32 : vector<8x1xi32> to vector<8x1xf32>
    %c0_13 = arith.constant 0 : index
    %c0_14 = arith.constant 0 : index
    %34 = vector.load %arg5[%c0_13, %c0_14] : memref<1x128xf32, #tpu.memory_space<vmem>>, vector<1x128xf32>
    %35 = vector.broadcast %33 : vector<8x1xf32> to vector<8x128xf32>
    %36 = arith.mulf %23, %35 : vector<8x128xf32>
    %cst_15 = arith.constant dense<0.000000e+00> : vector<128xf32>
    %37 = vector.multi_reduction <add>, %36, %cst_15 [0] : vector<8x128xf32> to vector<128xf32>
    %38 = vector.shape_cast %37 : vector<128xf32> to vector<1x128xf32>
    %39 = arith.addf %34, %38 : vector<1x128xf32>
    %c0_16 = arith.constant 0 : index
    %c0_17 = arith.constant 0 : index
    %40 = vector.load %arg5[%c0_16, %c0_17] : memref<1x128xf32, #tpu.memory_space<vmem>>, vector<1x128xf32>
    tpu.vector_store %arg5[%c0_16, %c0_17], %39 {strides = array<i32>} : memref<1x128xf32, #tpu.memory_space<vmem>>, vector<1x128xf32>,
    %41 = arith.subf %24, %3 : vector<8x128xf32>
    %42 = vector.broadcast %33 : vector<8x1xf32> to vector<8x128xf32>
    %43 = arith.mulf %41, %42 : vector<8x128xf32>
    %44 = arith.mulf %43, %43 : vector<8x128xf32>
    %cst_18 = arith.constant dense<0.000000e+00> : vector<128xf32>
    %45 = vector.multi_reduction <add>, %44, %cst_18 [0] : vector<8x128xf32> to vector<128xf32>
    %46 = vector.shape_cast %45 : vector<128xf32> to vector<1x128xf32>
    %c0_19 = arith.constant 0 : index
    %c0_20 = arith.constant 0 : index
    %47 = vector.load %arg6[%c0_19, %c0_20] : memref<1x1xf32, #tpu.memory_space<vmem>>, vector<1x1xf32>
    %cst_21 = arith.constant dense<0.000000e+00> : vector<1xf32>
    %48 = vector.multi_reduction <add>, %46, %cst_21 [1] : vector<1x128xf32> to vector<1xf32>
    %49 = vector.shape_cast %48 : vector<1xf32> to vector<1x1xf32>
    %50 = arith.addf %47, %49 : vector<1x1xf32>
    %c0_22 = arith.constant 0 : index
    %c0_23 = arith.constant 0 : index
    %51 = vector.load %arg6[%c0_22, %c0_23] : memref<1x1xf32, #tpu.memory_space<vmem>>, vector<1x1xf32>
    tpu.vector_store %arg6[%c0_22, %c0_23], %50 {strides = array<i32>} : memref<1x1xf32, #tpu.memory_space<vmem>>, vector<1x1xf32>,
    return
  }
  func.func @transform_0(%arg0: i32) -> (i32, i32) {
    %c0_i32 = arith.constant 0 : i32
    %c0_i32_0 = arith.constant 0 : i32
    return %arg0, %c0_i32 : i32, i32
  }
  func.func @transform_1(%arg0: i32) -> (i32, i32) {
    %c0_i32 = arith.constant 0 : i32
    %c0_i32_0 = arith.constant 0 : i32
    %c0_i32_1 = arith.constant 0 : i32
    return %c0_i32, %c0_i32_0 : i32, i32
  }
  func.func @transform_2(%arg0: i32) -> (i32, i32) {
    %c0_i32 = arith.constant 0 : i32
    %c0_i32_0 = arith.constant 0 : i32
    %c0_i32_1 = arith.constant 0 : i32
    return %c0_i32, %c0_i32_0 : i32, i32
  }
  func.func @transform_3(%arg0: i32) -> (i32, i32) {
    %c0_i32 = arith.constant 0 : i32
    %c0_i32_0 = arith.constant 0 : i32
    return %arg0, %c0_i32 : i32, i32
  }
  func.func @transform_4(%arg0: i32) -> (i32, i32) {
    %c0_i32 = arith.constant 0 : i32
    %c0_i32_0 = arith.constant 0 : i32
    %c0_i32_1 = arith.constant 0 : i32
    return %c0_i32, %c0_i32_0 : i32, i32
  }
  func.func @transform_5(%arg0: i32) -> (i32, i32) {
    %c0_i32 = arith.constant 0 : i32
    %c0_i32_0 = arith.constant 0 : i32
    %c0_i32_1 = arith.constant 0 : i32
    return %c0_i32, %c0_i32_0 : i32, i32
  }
}

module attributes {stable_mosaic.version = 11 : i64} {
  func.func @_mm_bias_act_kernel(%arg0: i32, %arg1: i32, %arg2: i32, %arg3: memref<8x128xbf16, #tpu.memory_space<vmem>>, %arg4: memref<128x128xbf16, #tpu.memory_space<vmem>>, %arg5: memref<1x128xf32, #tpu.memory_space<vmem>>, %arg6: memref<8x128xf32, #tpu.memory_space<vmem>>, %arg7: memref<8x128xf32, #tpu.memory_space<vmem>>) attributes {dimension_semantics = [#tpu.dimension_semantics<parallel>, #tpu.dimension_semantics<parallel>, #tpu.dimension_semantics<arbitrary>], iteration_bounds = array<i64: 1, 1, 1>, scalar_prefetch = 0 : i64, scratch_operands = 1 : i64, tpu.core_type = #tpu.core_type<tc>, window_params = [{transform_indices = @transform_0, window_bounds = array<i64: 8, 128>}, {transform_indices = @transform_1, window_bounds = array<i64: 128, 128>}, {transform_indices = @transform_2, window_bounds = array<i64: 1, 128>}, {transform_indices = @transform_3, window_bounds = array<i64: 8, 128>}]} {
    %c0_i32 = arith.constant 0 : i32
    %0 = arith.cmpi eq, %arg2, %c0_i32 : i32
    %1 = arith.extui %0 : i1 to i32
    %c0_i32_0 = arith.constant 0 : i32
    %2 = arith.cmpi ne, %1, %c0_i32_0 : i32
    scf.if %2 {
      %cst_10 = arith.constant 0.000000e+00 : f32
      %12 = vector.broadcast %cst_10 : f32 to vector<8x128xf32>
      %c0_11 = arith.constant 0 : index
      %c0_12 = arith.constant 0 : index
      %13 = vector.load %arg7[%c0_11, %c0_12] : memref<8x128xf32, #tpu.memory_space<vmem>>, vector<8x128xf32>
      tpu.vector_store %arg7[%c0_11, %c0_12], %12 {strides = array<i32>} : memref<8x128xf32, #tpu.memory_space<vmem>>, vector<8x128xf32>,
    } else {
    }
    %c0 = arith.constant 0 : index
    %c0_1 = arith.constant 0 : index
    %3 = vector.load %arg3[%c0, %c0_1] : memref<8x128xbf16, #tpu.memory_space<vmem>>, vector<8x128xbf16>
    %c0_2 = arith.constant 0 : index
    %c0_3 = arith.constant 0 : index
    %4 = vector.load %arg7[%c0_2, %c0_3] : memref<8x128xf32, #tpu.memory_space<vmem>>, vector<8x128xf32>
    %c0_4 = arith.constant 0 : index
    %c0_5 = arith.constant 0 : index
    %5 = vector.load %arg4[%c0_4, %c0_5] : memref<128x128xbf16, #tpu.memory_space<vmem>>, vector<128x128xbf16>
    %cst = arith.constant dense<0.000000e+00> : vector<8x128xf32>
    %6 = tpu.matmul %3, %5, %cst {dimension_numbers = #tpu.dot_dimension_numbers<[1], [0], [0], [1], [0, 0, 1, 1], [], []>} : vector<8x128xbf16>, vector<128x128xbf16>, vector<8x128xf32> -> vector<8x128xf32>
    %7 = arith.addf %4, %6 : vector<8x128xf32>
    %c0_6 = arith.constant 0 : index
    %c0_7 = arith.constant 0 : index
    %8 = vector.load %arg7[%c0_6, %c0_7] : memref<8x128xf32, #tpu.memory_space<vmem>>, vector<8x128xf32>
    tpu.vector_store %arg7[%c0_6, %c0_7], %7 {strides = array<i32>} : memref<8x128xf32, #tpu.memory_space<vmem>>, vector<8x128xf32>,
    %c0_i32_8 = arith.constant 0 : i32
    %9 = arith.cmpi eq, %arg2, %c0_i32_8 : i32
    %10 = arith.extui %9 : i1 to i32
    %c0_i32_9 = arith.constant 0 : i32
    %11 = arith.cmpi ne, %10, %c0_i32_9 : i32
    scf.if %11 {
      %c0_10 = arith.constant 0 : index
      %c0_11 = arith.constant 0 : index
      %12 = vector.load %arg7[%c0_10, %c0_11] : memref<8x128xf32, #tpu.memory_space<vmem>>, vector<8x128xf32>
      %c0_12 = arith.constant 0 : index
      %c0_13 = arith.constant 0 : index
      %13 = vector.load %arg5[%c0_12, %c0_13] : memref<1x128xf32, #tpu.memory_space<vmem>>, vector<1x128xf32>
      %14 = vector.broadcast %13 : vector<1x128xf32> to vector<8x128xf32>
      %15 = arith.addf %12, %14 : vector<8x128xf32>
      %cst_14 = arith.constant 0.000000e+00 : f32
      %16 = vector.broadcast %cst_14 : f32 to vector<8x128xf32>
      %17 = arith.maximumf %15, %16 : vector<8x128xf32>
      %c0_15 = arith.constant 0 : index
      %c0_16 = arith.constant 0 : index
      %18 = vector.load %arg6[%c0_15, %c0_16] : memref<8x128xf32, #tpu.memory_space<vmem>>, vector<8x128xf32>
      tpu.vector_store %arg6[%c0_15, %c0_16], %17 {strides = array<i32>} : memref<8x128xf32, #tpu.memory_space<vmem>>, vector<8x128xf32>,
    } else {
    }
    return
  }
  func.func @transform_0(%arg0: i32, %arg1: i32, %arg2: i32) -> (i32, i32) {
    %c0_i32 = arith.constant 0 : i32
    return %arg0, %arg2 : i32, i32
  }
  func.func @transform_1(%arg0: i32, %arg1: i32, %arg2: i32) -> (i32, i32) {
    %c0_i32 = arith.constant 0 : i32
    return %arg2, %arg1 : i32, i32
  }
  func.func @transform_2(%arg0: i32, %arg1: i32, %arg2: i32) -> (i32, i32) {
    %c0_i32 = arith.constant 0 : i32
    %c0_i32_0 = arith.constant 0 : i32
    return %c0_i32, %arg1 : i32, i32
  }
  func.func @transform_3(%arg0: i32, %arg1: i32, %arg2: i32) -> (i32, i32) {
    %c0_i32 = arith.constant 0 : i32
    return %arg0, %arg1 : i32, i32
  }
}

module attributes {stable_mosaic.version = 11 : i64} {
  func.func @_mm_bias_act_kernel(%arg0: i32, %arg1: i32, %arg2: i32, %arg3: memref<32x128xbf16, #tpu.memory_space<vmem>>, %arg4: memref<128x128xbf16, #tpu.memory_space<vmem>>, %arg5: memref<1x128xf32, #tpu.memory_space<vmem>>, %arg6: memref<32x128xf32, #tpu.memory_space<vmem>>, %arg7: memref<32x128xf32, #tpu.memory_space<vmem>>) attributes {dimension_semantics = [#tpu.dimension_semantics<parallel>, #tpu.dimension_semantics<parallel>, #tpu.dimension_semantics<arbitrary>], iteration_bounds = array<i64: 1, 1, 1>, scalar_prefetch = 0 : i64, scratch_operands = 1 : i64, tpu.core_type = #tpu.core_type<tc>, window_params = [{transform_indices = @transform_0, window_bounds = array<i64: 32, 128>}, {transform_indices = @transform_1, window_bounds = array<i64: 128, 128>}, {transform_indices = @transform_2, window_bounds = array<i64: 1, 128>}, {transform_indices = @transform_3, window_bounds = array<i64: 32, 128>}]} {
    %c0_i32 = arith.constant 0 : i32
    %0 = arith.cmpi eq, %arg2, %c0_i32 : i32
    %1 = arith.extui %0 : i1 to i32
    %c0_i32_0 = arith.constant 0 : i32
    %2 = arith.cmpi ne, %1, %c0_i32_0 : i32
    scf.if %2 {
      %cst_10 = arith.constant 0.000000e+00 : f32
      %12 = vector.broadcast %cst_10 : f32 to vector<32x128xf32>
      %c0_11 = arith.constant 0 : index
      %c0_12 = arith.constant 0 : index
      %13 = vector.load %arg7[%c0_11, %c0_12] : memref<32x128xf32, #tpu.memory_space<vmem>>, vector<32x128xf32>
      tpu.vector_store %arg7[%c0_11, %c0_12], %12 {strides = array<i32>} : memref<32x128xf32, #tpu.memory_space<vmem>>, vector<32x128xf32>,
    } else {
    }
    %c0 = arith.constant 0 : index
    %c0_1 = arith.constant 0 : index
    %3 = vector.load %arg3[%c0, %c0_1] : memref<32x128xbf16, #tpu.memory_space<vmem>>, vector<32x128xbf16>
    %c0_2 = arith.constant 0 : index
    %c0_3 = arith.constant 0 : index
    %4 = vector.load %arg7[%c0_2, %c0_3] : memref<32x128xf32, #tpu.memory_space<vmem>>, vector<32x128xf32>
    %c0_4 = arith.constant 0 : index
    %c0_5 = arith.constant 0 : index
    %5 = vector.load %arg4[%c0_4, %c0_5] : memref<128x128xbf16, #tpu.memory_space<vmem>>, vector<128x128xbf16>
    %cst = arith.constant dense<0.000000e+00> : vector<32x128xf32>
    %6 = tpu.matmul %3, %5, %cst {dimension_numbers = #tpu.dot_dimension_numbers<[1], [0], [0], [1], [0, 0, 1, 1], [], []>} : vector<32x128xbf16>, vector<128x128xbf16>, vector<32x128xf32> -> vector<32x128xf32>
    %7 = arith.addf %4, %6 : vector<32x128xf32>
    %c0_6 = arith.constant 0 : index
    %c0_7 = arith.constant 0 : index
    %8 = vector.load %arg7[%c0_6, %c0_7] : memref<32x128xf32, #tpu.memory_space<vmem>>, vector<32x128xf32>
    tpu.vector_store %arg7[%c0_6, %c0_7], %7 {strides = array<i32>} : memref<32x128xf32, #tpu.memory_space<vmem>>, vector<32x128xf32>,
    %c0_i32_8 = arith.constant 0 : i32
    %9 = arith.cmpi eq, %arg2, %c0_i32_8 : i32
    %10 = arith.extui %9 : i1 to i32
    %c0_i32_9 = arith.constant 0 : i32
    %11 = arith.cmpi ne, %10, %c0_i32_9 : i32
    scf.if %11 {
      %c0_10 = arith.constant 0 : index
      %c0_11 = arith.constant 0 : index
      %12 = vector.load %arg7[%c0_10, %c0_11] : memref<32x128xf32, #tpu.memory_space<vmem>>, vector<32x128xf32>
      %c0_12 = arith.constant 0 : index
      %c0_13 = arith.constant 0 : index
      %13 = vector.load %arg5[%c0_12, %c0_13] : memref<1x128xf32, #tpu.memory_space<vmem>>, vector<1x128xf32>
      %14 = vector.broadcast %13 : vector<1x128xf32> to vector<32x128xf32>
      %15 = arith.addf %12, %14 : vector<32x128xf32>
      %c0_14 = arith.constant 0 : index
      %c0_15 = arith.constant 0 : index
      %16 = vector.load %arg6[%c0_14, %c0_15] : memref<32x128xf32, #tpu.memory_space<vmem>>, vector<32x128xf32>
      tpu.vector_store %arg6[%c0_14, %c0_15], %15 {strides = array<i32>} : memref<32x128xf32, #tpu.memory_space<vmem>>, vector<32x128xf32>,
    } else {
    }
    return
  }
  func.func @transform_0(%arg0: i32, %arg1: i32, %arg2: i32) -> (i32, i32) {
    %c0_i32 = arith.constant 0 : i32
    return %arg0, %arg2 : i32, i32
  }
  func.func @transform_1(%arg0: i32, %arg1: i32, %arg2: i32) -> (i32, i32) {
    %c0_i32 = arith.constant 0 : i32
    return %arg2, %arg1 : i32, i32
  }
  func.func @transform_2(%arg0: i32, %arg1: i32, %arg2: i32) -> (i32, i32) {
    %c0_i32 = arith.constant 0 : i32
    %c0_i32_0 = arith.constant 0 : i32
    return %c0_i32, %arg1 : i32, i32
  }
  func.func @transform_3(%arg0: i32, %arg1: i32, %arg2: i32) -> (i32, i32) {
    %c0_i32 = arith.constant 0 : i32
    return %arg0, %arg1 : i32, i32
  }
}

</mosaic_0001>

<bundles_post_ra>
// kernel: _lambda_.26
= control target key start
LH: loop header
LB: loop body
LE: loop exit
PB: predicated region body
PF: predicated region fallthrough
CT: control target
= control target key end

     0   :  { %s310_s1 = inlined_call_operand.vmem [shape: bf16[128,128], index: 1, kind: input, shape index: {}]   ;;  %s311_s0 = inlined_call_operand.vmem [shape: bf16[32,128], index: 0, kind: input, shape index: {}]   ;;  %s312_s2 = inlined_call_operand.vmem [shape: f32[1,128], index: 2, kind: input, shape index: {}]   ;;  %s313_s3 = inlined_call_operand.vmem [shape: f32[32,128], index: 3, kind: output, shape index: {}]  }
   0x1   :  { %v235_v0 = vld [vmem:[%s310_s1 + $0x38] sm:$0xff]   ;;  %v236_v1 = vld [vmem:[%s310_s1 + $0x30] sm:$0xff]   ;;  %v237_v2 = vld [vmem:[%s310_s1 + $0x28] sm:$0xff]  }
   0x2   :  { %215 = vmatprep.subr.bf16.mxu0 %v235_v0  ;;  %v238_v3 = vld [vmem:[%s310_s1 + $0x20] sm:$0xff]   ;;  %v239_v5 = vld [vmem:[%s310_s1 + $0x18] sm:$0xff]   ;;  %v240_v6 = vld [vmem:[%s310_s1 + $0x10] sm:$0xff]  }
   0x3   :  { %216 = vmatpush3.bf16.msra.mxu0 %v235_v0  ;;  %v243_v4 = vld [vmem:[%s311_s0] sm:$0xff]   ;;  %v241_v7 = vld [vmem:[%s310_s1 + $0x8] sm:$0xff]  }
   0x4   :  { %217 = vmatprep.subr.bf16.mxu0 %v236_v1  ;;  %231 = vmatprep.mubr.bf16.mxu0 %v243_v4  ;;  %v242_v8 = vld [vmem:[%s310_s1] sm:$0xff]   ;;  %v244_v9 = vld [vmem:[%s311_s0 + $0x8] sm:$0xff]  }
   0x5   :  { %v204_v10 = vld [vmem:[%s312_s2] ss:$0 sm:$0xff] }
   0x7   :  { %218 = vmatpush3.bf16.msra.mxu0 %v236_v1 }
   0x8   :  { %219 = vmatprep.subr.bf16.mxu0 %v237_v2 }
   0xb   :  { %220 = vmatpush3.bf16.msra.mxu0 %v237_v2 }
   0xc   :  { %221 = vmatprep.subr.bf16.mxu0 %v238_v3 }
   0xf   :  { %222 = vmatpush3.bf16.msra.mxu0 %v238_v3 }
  0x10   :  { %223 = vmatprep.subr.bf16.mxu0 %v239_v5 }
  0x13   :  { %224 = vmatpush3.bf16.msra.mxu0 %v239_v5 }
  0x14   :  { %225 = vmatprep.subr.bf16.mxu0 %v240_v6 }
  0x17   :  { %226 = vmatpush3.bf16.msra.mxu0 %v240_v6 }
  0x18   :  { %227 = vmatprep.subr.bf16.mxu0 %v241_v7 }
  0x1b   :  { %228 = vmatpush3.bf16.msra.mxu0 %v241_v7 }
  0x1c   :  { %229 = vmatprep.subr.bf16.mxu0 %v242_v8 }
  0x1f   :  { %230 = vmatpush3.bf16.msra.mxu0 %v242_v8 }
  0x22   :  { %232 = vmatmul.mubr.bf16.vlgmr.msra.gmra.mxu0 %v244_v9 }
  0xe2   :  { %v233_v11 = vpop.f32.mrf.mxu0 }
  0xe3   :  { %v180_v12 = vadd.f32 %v233_v11, %v204_v10 }
  0xe4   :  { %v141_v13 = vpop.f32.mrf.mxu0 }
  0xe5   :  { %v184_v14 = vmax.f32 %v180_v12, 0.0  ;;  %v178_v15 = vadd.f32 %v204_v10, %v141_v13 }
  0xe6   :  { %v234_v16 = vpop.f32.mrf.mxu0 }
  0xe7   :  { %188 = vst [vmem:[%s313_s3 + $0x10] sm:$0xff] %v184_v14  ;;  %v182_v17 = vmax.f32 %v178_v15, 0.0  ;;  %v181_v18 = vadd.f32 %v234_v16, %v204_v10 }
  0xe8   :  { %v144_v19 = vpop.f32.mrf.mxu0 }
  0xe9   :  { %186 = vst [vmem:[%s313_s3] sm:$0xff] %v182_v17  ;;  %v185_v20 = vmax.f32 %v181_v18, 0.0  ;;  %v179_v21 = vadd.f32 %v204_v10, %v144_v19 }
  0xeb   :  { %189 = vst [vmem:[%s313_s3 + $0x18] sm:$0xff] %v185_v20  ;;  %v183_v22 = vmax.f32 %v179_v21, 0.0 }
  0xed   :  { %187 = vst [vmem:[%s313_s3 + $0x8] sm:$0xff] %v183_v22 }

// kernel: _lambda_.27
= control target key start
LH: loop header
LB: loop body
LE: loop exit
PB: predicated region body
PF: predicated region fallthrough
CT: control target
= control target key end

     0   :  { %v210_v0 = vmov 0.0   ;;  %vm211_vm0 = vmmov 0   ;;  %s268_s1 = inlined_call_operand.vmem [shape: bf16[128,128], index: 1, kind: input, shape index: {}]   ;;  %s269_s0 = inlined_call_operand.vmem [shape: bf16[16,128], index: 0, kind: input, shape index: {}]   ;;  %s270_s2 = inlined_call_operand.vmem [shape: f32[1,128], index: 2, kind: input, shape index: {}]   ;;  %s271_s3 = inlined_call_operand.vmem [shape: f32[16,128], index: 3, kind: output, shape index: {}]  }
   0x1   :  { %179 = vmatprep.subr.bf16.mxu0 %v210_v0  ;;  %v201_v1 = vld [vmem:[%s268_s1 + $0x38] sm:$0xff]   ;;  %195 = vmatprep.mubr.msk.bf16.mxu0 %vm211_vm0, %v210_v0  ;;  %v202_v2 = vld [vmem:[%s268_s1 + $0x30] sm:$0xff]   ;;  %v203_v3 = vld [vmem:[%s268_s1 + $0x28] sm:$0xff]  }
   0x2   :  { %180 = vmatpush3.bf16.msra.mxu0 %v201_v1  ;;  %v204_v4 = vld [vmem:[%s268_s1 + $0x20] sm:$0xff]   ;;  %v205_v5 = vld [vmem:[%s268_s1 + $0x18] sm:$0xff]   ;;  %v206_v6 = vld [vmem:[%s268_s1 + $0x10] sm:$0xff]  }
   0x3   :  { %181 = vmatprep.subr.bf16.mxu0 %v210_v0  ;;  %v207_v7 = vld [vmem:[%s268_s1 + $0x8] sm:$0xff]   ;;  %v208_v8 = vld [vmem:[%s268_s1] sm:$0xff]  }
   0x4   :  { %v209_v9 = vld [vmem:[%s269_s0] sm:$0xff]  }
   0x5   :  { %v169_v10 = vld [vmem:[%s270_s2] ss:$0 sm:$0xff] }
   0x6   :  { %182 = vmatpush3.bf16.msra.mxu0 %v202_v2 }
   0x7   :  { %183 = vmatprep.subr.bf16.mxu0 %v210_v0 }
   0xa   :  { %184 = vmatpush3.bf16.msra.mxu0 %v203_v3 }
   0xb   :  { %185 = vmatprep.subr.bf16.mxu0 %v210_v0 }
   0xe   :  { %186 = vmatpush3.bf16.msra.mxu0 %v204_v4 }
   0xf   :  { %187 = vmatprep.subr.bf16.mxu0 %v210_v0 }
  0x12   :  { %188 = vmatpush3.bf16.msra.mxu0 %v205_v5 }
  0x13   :  { %189 = vmatprep.subr.bf16.mxu0 %v210_v0 }
  0x16   :  { %190 = vmatpush3.bf16.msra.mxu0 %v206_v6 }
  0x17   :  { %191 = vmatprep.subr.bf16.mxu0 %v210_v0 }
  0x1a   :  { %192 = vmatpush3.bf16.msra.mxu0 %v207_v7 }
  0x1b   :  { %193 = vmatprep.subr.bf16.mxu0 %v210_v0 }
  0x1e   :  { %194 = vmatpush3.bf16.msra.mxu0 %v208_v8 }
  0x21   :  { %196 = vmatmul.mubr.bf16.vlgmr.msra.gmra.mxu0 %v209_v9 }
  0xe1   :  { %v129_v11 = vpop.f32.mrf.mxu0 }
  0xe2   :  { %v152_v12 = vadd.f32 %v169_v10, %v129_v11 }
  0xe3   :  { %v197_v13 = vpop.f32.mrf.mxu0 }
  0xe4   :  { %154 = vst [vmem:[%s271_s3] sm:$0xff] %v152_v12 }
  0xe5   :  { %v132_v14 = vpop.f32.mrf.mxu0 }
  0xe6   :  { %v153_v15 = vadd.f32 %v169_v10, %v132_v14 }
  0xe7   :  { %v198_v16 = vpop.f32.mrf.mxu0 }
  0xe8   :  { %155 = vst [vmem:[%s271_s3 + $0x8] sm:$0xff] %v153_v15 }

// kernel: _lambda_.28
= control target key start
LH: loop header
LB: loop body
LE: loop exit
PB: predicated region body
PF: predicated region fallthrough
CT: control target
= control target key end

     0   :  { %v214_v0 = vmov 0.0   ;;  %vm215_vm0 = vmmov 0   ;;  %v216_v10 = vmov 0   ;;  %s276_s1 = inlined_call_operand.vmem [shape: bf16[128,128], index: 1, kind: input, shape index: {}]   ;;  %s277_s0 = inlined_call_operand.vmem [shape: bf16[16,128], index: 0, kind: input, shape index: {}]   ;;  %s278_s2 = inlined_call_operand.vmem [shape: f32[1,128], index: 2, kind: input, shape index: {}]   ;;  %s279_s3 = inlined_call_operand.vmem [shape: f32[16,128], index: 3, kind: output, shape index: {}]  }
   0x1   :  { %183 = vmatprep.subr.bf16.mxu0 %v214_v0  ;;  %v206_v1 = vld [vmem:[%s276_s1 + $0x38] sm:$0xff]   ;;  %199 = vmatprep.mubr.msk.bf16.mxu0 %vm215_vm0, %v214_v0  ;;  %v207_v2 = vld [vmem:[%s276_s1 + $0x30] sm:$0xff]   ;;  %v208_v3 = vld [vmem:[%s276_s1 + $0x28] sm:$0xff]  }
   0x2   :  { %184 = vmatpush3.bf16.msra.mxu0 %v206_v1  ;;  %v209_v4 = vld [vmem:[%s276_s1 + $0x20] sm:$0xff]   ;;  %v210_v5 = vld [vmem:[%s276_s1 + $0x18] sm:$0xff]   ;;  %v211_v6 = vld [vmem:[%s276_s1 + $0x10] sm:$0xff]  }
   0x3   :  { %185 = vmatprep.subr.bf16.mxu0 %v214_v0  ;;  %v212_v7 = vld [vmem:[%s276_s1 + $0x8] sm:$0xff]   ;;  %v21_v8 = vld [vmem:[%s277_s0] sm:$0xf]  ;;  %v22_v9 = vld [vmem:[%s277_s0 + $0x4] sm:$0xf] }
   0x4   :  { %v23_v11 = vmax.bf16 %v216_v10, %v21_v8  ;;  %v24_v12 = vmax.bf16 %v216_v10, %v22_v9  ;;  %v213_v13 = vld [vmem:[%s276_s1] sm:$0xff]  }
   0x5   :  { %v173_v15 = vld [vmem:[%s278_s2] ss:$0 sm:$0xff] }
   0x6   :  { %186 = vmatpush3.bf16.msra.mxu0 %v207_v2  ;;  %v164_v14 = vcombine.low %v23_v11, %v24_v12 }
   0x7   :  { %187 = vmatprep.subr.bf16.mxu0 %v214_v0 }
   0xa   :  { %188 = vmatpush3.bf16.msra.mxu0 %v208_v3 }
   0xb   :  { %189 = vmatprep.subr.bf16.mxu0 %v214_v0 }
   0xe   :  { %190 = vmatpush3.bf16.msra.mxu0 %v209_v4 }
   0xf   :  { %191 = vmatprep.subr.bf16.mxu0 %v214_v0 }
  0x12   :  { %192 = vmatpush3.bf16.msra.mxu0 %v210_v5 }
  0x13   :  { %193 = vmatprep.subr.bf16.mxu0 %v214_v0 }
  0x16   :  { %194 = vmatpush3.bf16.msra.mxu0 %v211_v6 }
  0x17   :  { %195 = vmatprep.subr.bf16.mxu0 %v214_v0 }
  0x1a   :  { %196 = vmatpush3.bf16.msra.mxu0 %v212_v7 }
  0x1b   :  { %197 = vmatprep.subr.bf16.mxu0 %v214_v0 }
  0x1e   :  { %198 = vmatpush3.bf16.msra.mxu0 %v213_v13 }
  0x21   :  { %200 = vmatmul.mubr.bf16.vlgmr.msra.gmra.mxu0 %v164_v14 }
  0xe1   :  { %v131_v16 = vpop.f32.mrf.mxu0 }
  0xe2   :  { %v154_v17 = vadd.f32 %v173_v15, %v131_v16 }
  0xe3   :  { %v201_v18 = vpop.f32.mrf.mxu0 }
  0xe4   :  { %v156_v19 = vmax.f32 %v154_v17, 0.0 }
  0xe5   :  { %v134_v20 = vpop.f32.mrf.mxu0 }
  0xe6   :  { %158 = vst [vmem:[%s279_s3] sm:$0xff] %v156_v19  ;;  %v155_v21 = vadd.f32 %v173_v15, %v134_v20 }
  0xe7   :  { %v202_v22 = vpop.f32.mrf.mxu0 }
  0xe8   :  { %v157_v23 = vmax.f32 %v155_v21, 0.0 }
  0xea   :  { %159 = vst [vmem:[%s279_s3 + $0x8] sm:$0xff] %v157_v23 }

// kernel: _lambda_.29
= control target key start
LH: loop header
LB: loop body
LE: loop exit
PB: predicated region body
PF: predicated region fallthrough
CT: control target
= control target key end

     0   :  { %v217_v0 = vmov 0.0   ;;  %vm218_vm0 = vmmov 0   ;;  %s286_s1 = inlined_call_operand.vmem [shape: bf16[128,128], index: 1, kind: input, shape index: {}]   ;;  %s287_s0 = inlined_call_operand.vmem [shape: bf16[16,128], index: 0, kind: input, shape index: {}]   ;;  %s288_s2 = inlined_call_operand.vmem [shape: f32[1,128], index: 2, kind: input, shape index: {}]   ;;  %s289_s3 = inlined_call_operand.vmem [shape: f32[16,128], index: 3, kind: input, shape index: {}]   ;;  %s290_s4 = inlined_call_operand.vmem [shape: f32[16,128], index: 4, kind: output, shape index: {}]  }
   0x1   :  { %186 = vmatprep.subr.bf16.mxu0 %v217_v0  ;;  %v208_v1 = vld [vmem:[%s286_s1 + $0x38] sm:$0xff]   ;;  %202 = vmatprep.mubr.msk.bf16.mxu0 %vm218_vm0, %v217_v0  ;;  %v209_v2 = vld [vmem:[%s286_s1 + $0x30] sm:$0xff]   ;;  %v210_v3 = vld [vmem:[%s286_s1 + $0x28] sm:$0xff]  }
   0x2   :  { %187 = vmatpush3.bf16.msra.mxu0 %v208_v1  ;;  %v211_v4 = vld [vmem:[%s286_s1 + $0x20] sm:$0xff]   ;;  %v212_v5 = vld [vmem:[%s286_s1 + $0x18] sm:$0xff]   ;;  %v213_v6 = vld [vmem:[%s286_s1 + $0x10] sm:$0xff]  }
   0x3   :  { %188 = vmatprep.subr.bf16.mxu0 %v217_v0  ;;  %v214_v7 = vld [vmem:[%s286_s1 + $0x8] sm:$0xff]   ;;  %v215_v8 = vld [vmem:[%s286_s1] sm:$0xff]  }
   0x4   :  { %v216_v9 = vld [vmem:[%s287_s0] sm:$0xff]   ;;  %v158_v17 = vld [vmem:[%s289_s3 + $0x8] sm:$0xff] }
   0x5   :  { %v176_v10 = vld [vmem:[%s288_s2] ss:$0 sm:$0xff] }
   0x6   :  { %189 = vmatpush3.bf16.msra.mxu0 %v209_v2  ;;  %v157_v12 = vld [vmem:[%s289_s3] sm:$0xff] }
   0x7   :  { %190 = vmatprep.subr.bf16.mxu0 %v217_v0 }
   0xa   :  { %191 = vmatpush3.bf16.msra.mxu0 %v210_v3 }
   0xb   :  { %192 = vmatprep.subr.bf16.mxu0 %v217_v0 }
   0xe   :  { %193 = vmatpush3.bf16.msra.mxu0 %v211_v4 }
   0xf   :  { %194 = vmatprep.subr.bf16.mxu0 %v217_v0 }
  0x12   :  { %195 = vmatpush3.bf16.msra.mxu0 %v212_v5 }
  0x13   :  { %196 = vmatprep.subr.bf16.mxu0 %v217_v0 }
  0x16   :  { %197 = vmatpush3.bf16.msra.mxu0 %v213_v6 }
  0x17   :  { %198 = vmatprep.subr.bf16.mxu0 %v217_v0 }
  0x1a   :  { %199 = vmatpush3.bf16.msra.mxu0 %v214_v7 }
  0x1b   :  { %200 = vmatprep.subr.bf16.mxu0 %v217_v0 }
  0x1e   :  { %201 = vmatpush3.bf16.msra.mxu0 %v215_v8 }
  0x21   :  { %203 = vmatmul.mubr.bf16.vlgmr.msra.gmra.mxu0 %v216_v9 }
  0xe1   :  { %v132_v11 = vpop.f32.mrf.mxu0 }
  0xe2   :  { %v155_v13 = vadd.f32 %v176_v10, %v132_v11 }
  0xe3   :  { %v204_v14 = vpop.f32.mrf.mxu0 }
  0xe4   :  { %v159_v15 = vadd.f32 %v157_v12, %v155_v13 }
  0xe5   :  { %v135_v16 = vpop.f32.mrf.mxu0 }
  0xe6   :  { %161 = vst [vmem:[%s290_s4] sm:$0xff] %v159_v15  ;;  %v156_v18 = vadd.f32 %v176_v10, %v135_v16 }
  0xe7   :  { %v205_v19 = vpop.f32.mrf.mxu0 }
  0xe8   :  { %v160_v20 = vadd.f32 %v158_v17, %v156_v18 }
  0xea   :  { %162 = vst [vmem:[%s290_s4 + $0x8] sm:$0xff] %v160_v20 }

// kernel: _lambda_.32
= control target key start
LH: loop header
LB: loop body
LE: loop exit
PB: predicated region body
PF: predicated region fallthrough
CT: control target
= control target key end

     0   :  { %v193_v0 = vmov 0.0   ;;  %vm194_vm0 = vmmov 0   ;;  %s248_s1 = inlined_call_operand.vmem [shape: bf16[128,128], index: 1, kind: input, shape index: {}]   ;;  %s249_s0 = inlined_call_operand.vmem [shape: bf16[8,128], index: 0, kind: input, shape index: {}]   ;;  %s250_s2 = inlined_call_operand.vmem [shape: f32[1,128], index: 2, kind: input, shape index: {}]   ;;  %s251_s3 = inlined_call_operand.vmem [shape: f32[8,128], index: 3, kind: output, shape index: {}]  }
   0x1   :  { %163 = vmatprep.subr.bf16.mxu0 %v193_v0  ;;  %v185_v1 = vld [vmem:[%s248_s1 + $0x38] sm:$0xff]   ;;  %179 = vmatprep.mubr.msk.bf16.mxu0 %vm194_vm0, %v193_v0  ;;  %v186_v2 = vld [vmem:[%s248_s1 + $0x30] sm:$0xff]   ;;  %v187_v3 = vld [vmem:[%s248_s1 + $0x28] sm:$0xff]  }
   0x2   :  { %164 = vmatpush3.bf16.msra.mxu0 %v185_v1  ;;  %v188_v4 = vld [vmem:[%s248_s1 + $0x20] sm:$0xff]   ;;  %v189_v5 = vld [vmem:[%s248_s1 + $0x18] sm:$0xff]   ;;  %v190_v6 = vld [vmem:[%s248_s1 + $0x10] sm:$0xff]  }
   0x3   :  { %165 = vmatprep.subr.bf16.mxu0 %v193_v0  ;;  %v191_v7 = vld [vmem:[%s248_s1 + $0x8] sm:$0xff]   ;;  %v192_v8 = vld [vmem:[%s248_s1] sm:$0xff]  }
   0x4   :  { %v20_v9 = vld [vmem:[%s249_s0] sm:$0xf] }
   0x5   :  { %v153_v10 = vld [vmem:[%s250_s2] ss:$0 sm:$0xff] }
   0x6   :  { %166 = vmatpush3.bf16.msra.mxu0 %v186_v2 }
   0x7   :  { %167 = vmatprep.subr.bf16.mxu0 %v193_v0 }
   0xa   :  { %168 = vmatpush3.bf16.msra.mxu0 %v187_v3 }
   0xb   :  { %169 = vmatprep.subr.bf16.mxu0 %v193_v0 }
   0xe   :  { %170 = vmatpush3.bf16.msra.mxu0 %v188_v4 }
   0xf   :  { %171 = vmatprep.subr.bf16.mxu0 %v193_v0 }
  0x12   :  { %172 = vmatpush3.bf16.msra.mxu0 %v189_v5 }
  0x13   :  { %173 = vmatprep.subr.bf16.mxu0 %v193_v0 }
  0x16   :  { %174 = vmatpush3.bf16.msra.mxu0 %v190_v6 }
  0x17   :  { %175 = vmatprep.subr.bf16.mxu0 %v193_v0 }
  0x1a   :  { %176 = vmatpush3.bf16.msra.mxu0 %v191_v7 }
  0x1b   :  { %177 = vmatprep.subr.bf16.mxu0 %v193_v0 }
  0x1e   :  { %178 = vmatpush3.bf16.msra.mxu0 %v192_v8 }
  0x21   :  { %180 = vmatmul.mubr.bf16.vlgmr.msra.gmra.mxu0 %v20_v9 }
  0xe1   :  { %v120_v11 = vpop.f32.mrf.mxu0 }
  0xe2   :  { %v139_v12 = vadd.f32 %v153_v10, %v120_v11 }
  0xe3   :  { %v181_v13 = vpop.f32.mrf.mxu0 }
  0xe4   :  { %140 = vst [vmem:[%s251_s3] sm:$0xff] %v139_v12 }
  0xe5   :  { %v123_v14 = vpop.f32.mrf.mxu0 }
  0xe7   :  { %v182_v15 = vpop.f32.mrf.mxu0 }

// kernel: _lambda_.33
= control target key start
LH: loop header
LB: loop body
LE: loop exit
PB: predicated region body
PF: predicated region fallthrough
CT: control target
= control target key end

     0   :  { %v196_v0 = vmov 0.0   ;;  %vm197_vm0 = vmmov 0   ;;  %v198_v10 = vmov 0   ;;  %s252_s1 = inlined_call_operand.vmem [shape: bf16[128,128], index: 1, kind: input, shape index: {}]   ;;  %s253_s0 = inlined_call_operand.vmem [shape: bf16[8,128], index: 0, kind: input, shape index: {}]   ;;  %s254_s2 = inlined_call_operand.vmem [shape: f32[1,128], index: 2, kind: input, shape index: {}]   ;;  %s255_s3 = inlined_call_operand.vmem [shape: f32[8,128], index: 3, kind: output, shape index: {}]  }
   0x1   :  { %165 = vmatprep.subr.bf16.mxu0 %v196_v0  ;;  %v188_v1 = vld [vmem:[%s252_s1 + $0x38] sm:$0xff]   ;;  %181 = vmatprep.mubr.msk.bf16.mxu0 %vm197_vm0, %v196_v0  ;;  %v189_v2 = vld [vmem:[%s252_s1 + $0x30] sm:$0xff]   ;;  %v190_v3 = vld [vmem:[%s252_s1 + $0x28] sm:$0xff]  }
   0x2   :  { %166 = vmatpush3.bf16.msra.mxu0 %v188_v1  ;;  %v191_v4 = vld [vmem:[%s252_s1 + $0x20] sm:$0xff]   ;;  %v192_v5 = vld [vmem:[%s252_s1 + $0x18] sm:$0xff]   ;;  %v193_v6 = vld [vmem:[%s252_s1 + $0x10] sm:$0xff]  }
   0x3   :  { %167 = vmatprep.subr.bf16.mxu0 %v196_v0  ;;  %v194_v7 = vld [vmem:[%s252_s1 + $0x8] sm:$0xff]   ;;  %v195_v8 = vld [vmem:[%s252_s1] sm:$0xff]  }
   0x4   :  { %v20_v9 = vld [vmem:[%s253_s0] sm:$0xf] }
   0x5   :  { %v21_v11 = vmax.bf16 %v198_v10, %v20_v9  ;;  %v155_v12 = vld [vmem:[%s254_s2] ss:$0 sm:$0xff] }
   0x6   :  { %168 = vmatpush3.bf16.msra.mxu0 %v189_v2 }
   0x7   :  { %169 = vmatprep.subr.bf16.mxu0 %v196_v0 }
   0xa   :  { %170 = vmatpush3.bf16.msra.mxu0 %v190_v3 }
   0xb   :  { %171 = vmatprep.subr.bf16.mxu0 %v196_v0 }
   0xe   :  { %172 = vmatpush3.bf16.msra.mxu0 %v191_v4 }
   0xf   :  { %173 = vmatprep.subr.bf16.mxu0 %v196_v0 }
  0x12   :  { %174 = vmatpush3.bf16.msra.mxu0 %v192_v5 }
  0x13   :  { %175 = vmatprep.subr.bf16.mxu0 %v196_v0 }
  0x16   :  { %176 = vmatpush3.bf16.msra.mxu0 %v193_v6 }
  0x17   :  { %177 = vmatprep.subr.bf16.mxu0 %v196_v0 }
  0x1a   :  { %178 = vmatpush3.bf16.msra.mxu0 %v194_v7 }
  0x1b   :  { %179 = vmatprep.subr.bf16.mxu0 %v196_v0 }
  0x1e   :  { %180 = vmatpush3.bf16.msra.mxu0 %v195_v8 }
  0x21   :  { %182 = vmatmul.mubr.bf16.vlgmr.msra.gmra.mxu0 %v21_v11 }
  0xe1   :  { %v121_v13 = vpop.f32.mrf.mxu0 }
  0xe2   :  { %v140_v14 = vadd.f32 %v155_v12, %v121_v13 }
  0xe3   :  { %v183_v15 = vpop.f32.mrf.mxu0 }
  0xe4   :  { %v141_v16 = vmax.f32 %v140_v14, 0.0 }
  0xe5   :  { %v124_v17 = vpop.f32.mrf.mxu0 }
  0xe6   :  { %142 = vst [vmem:[%s255_s3] sm:$0xff] %v141_v16 }
  0xe7   :  { %v184_v18 = vpop.f32.mrf.mxu0 }

// kernel: _lambda_.34
= control target key start
LH: loop header
LB: loop body
LE: loop exit
PB: predicated region body
PF: predicated region fallthrough
CT: control target
= control target key end

     0   :  { %v198_v0 = vmov 0.0   ;;  %vm199_vm0 = vmmov 0   ;;  %s261_s1 = inlined_call_operand.vmem [shape: bf16[128,128], index: 1, kind: input, shape index: {}]   ;;  %s262_s0 = inlined_call_operand.vmem [shape: bf16[8,128], index: 0, kind: input, shape index: {}]   ;;  %s263_s2 = inlined_call_operand.vmem [shape: f32[1,128], index: 2, kind: input, shape index: {}]   ;;  %s264_s3 = inlined_call_operand.vmem [shape: f32[8,128], index: 3, kind: input, shape index: {}]   ;;  %s265_s4 = inlined_call_operand.vmem [shape: f32[8,128], index: 4, kind: output, shape index: {}]  }
   0x1   :  { %168 = vmatprep.subr.bf16.mxu0 %v198_v0  ;;  %v190_v1 = vld [vmem:[%s261_s1 + $0x38] sm:$0xff]   ;;  %184 = vmatprep.mubr.msk.bf16.mxu0 %vm199_vm0, %v198_v0  ;;  %v191_v2 = vld [vmem:[%s261_s1 + $0x30] sm:$0xff]   ;;  %v192_v3 = vld [vmem:[%s261_s1 + $0x28] sm:$0xff]  }
   0x2   :  { %169 = vmatpush3.bf16.msra.mxu0 %v190_v1  ;;  %v193_v4 = vld [vmem:[%s261_s1 + $0x20] sm:$0xff]   ;;  %v194_v5 = vld [vmem:[%s261_s1 + $0x18] sm:$0xff]   ;;  %v195_v6 = vld [vmem:[%s261_s1 + $0x10] sm:$0xff]  }
   0x3   :  { %170 = vmatprep.subr.bf16.mxu0 %v198_v0  ;;  %v196_v7 = vld [vmem:[%s261_s1 + $0x8] sm:$0xff]   ;;  %v197_v8 = vld [vmem:[%s261_s1] sm:$0xff]  }
   0x4   :  { %v23_v9 = vld [vmem:[%s262_s0] sm:$0xf] }
   0x5   :  { %v158_v10 = vld [vmem:[%s263_s2] ss:$0 sm:$0xff] }
   0x6   :  { %171 = vmatpush3.bf16.msra.mxu0 %v191_v2  ;;  %v143_v12 = vld [vmem:[%s264_s3] sm:$0xff] }
   0x7   :  { %172 = vmatprep.subr.bf16.mxu0 %v198_v0 }
   0xa   :  { %173 = vmatpush3.bf16.msra.mxu0 %v192_v3 }
   0xb   :  { %174 = vmatprep.subr.bf16.mxu0 %v198_v0 }
   0xe   :  { %175 = vmatpush3.bf16.msra.mxu0 %v193_v4 }
   0xf   :  { %176 = vmatprep.subr.bf16.mxu0 %v198_v0 }
  0x12   :  { %177 = vmatpush3.bf16.msra.mxu0 %v194_v5 }
  0x13   :  { %178 = vmatprep.subr.bf16.mxu0 %v198_v0 }
  0x16   :  { %179 = vmatpush3.bf16.msra.mxu0 %v195_v6 }
  0x17   :  { %180 = vmatprep.subr.bf16.mxu0 %v198_v0 }
  0x1a   :  { %181 = vmatpush3.bf16.msra.mxu0 %v196_v7 }
  0x1b   :  { %182 = vmatprep.subr.bf16.mxu0 %v198_v0 }
  0x1e   :  { %183 = vmatpush3.bf16.msra.mxu0 %v197_v8 }
  0x21   :  { %185 = vmatmul.mubr.bf16.vlgmr.msra.gmra.mxu0 %v23_v9 }
  0xe1   :  { %v123_v11 = vpop.f32.mrf.mxu0 }
  0xe2   :  { %v142_v13 = vadd.f32 %v158_v10, %v123_v11 }
  0xe3   :  { %v186_v14 = vpop.f32.mrf.mxu0 }
  0xe4   :  { %v144_v15 = vadd.f32 %v143_v12, %v142_v13 }
  0xe5   :  { %v126_v16 = vpop.f32.mrf.mxu0 }
  0xe6   :  { %145 = vst [vmem:[%s265_s4] sm:$0xff] %v144_v15 }
  0xe7   :  { %v187_v17 = vpop.f32.mrf.mxu0 }

// kernel: _lambda_.38
= control target key start
LH: loop header
LB: loop body
LE: loop exit
PB: predicated region body
PF: predicated region fallthrough
CT: control target
= control target key end

     0   :  { %v403_v1 = vmov 0.0   ;;  %vm404_vm0 = vmmov 0   ;;  %s549_s0 = inlined_call_operand.vmem [shape: f32[8,128], index: 0, kind: input, shape index: {}]   ;;  %s550_s1 = inlined_call_operand.vmem [shape: f32[128,128], index: 1, kind: input, shape index: {}]   ;;  %s551_s2 = inlined_call_operand.vmem [shape: f32[1,128], index: 2, kind: input, shape index: {}]   ;;  %s552_s3 = inlined_call_operand.vmem [shape: f32[8,128], index: 3, kind: output, shape index: {0}]   ;;  %s553_s4 = inlined_call_operand.vmem [shape: f32[1,128], index: 4, kind: output, shape index: {1}]   ;;  %s554_s5 = inlined_call_operand.hbm [shape: f32[1,1], index: 5, kind: output, shape index: {2}]  }
   0x1   :  { %v41_v0 = vld [vmem:[%s550_s1 + $0x78] sm:$0xff]  ;;  %307 = vmatprep.subr.mxu0 %v403_v1  ;;  %22 = vst [vmem:[%s553_s4] sm:$0x1] %v403_v1  ;;  %v40_v2 = vld [vmem:[%s550_s1 + $0x70] sm:$0xff]  ;;  %339 = vmatprep.mubr.msk.f32.mxu0 %vm404_vm0, %v403_v1  ;;  %v39_v3 = vld [vmem:[%s550_s1 + $0x68] sm:$0xff] }
   0x2   :  { %308 = vmatpush3.msra.mxu0 %v41_v0  ;;  %342 = vmatprep.subr.mxu1 %v403_v1  ;;  %v38_v4 = vld [vmem:[%s550_s1 + $0x60] sm:$0xff] }
   0x3   :  { %309 = vmatprep.subr.mxu0 %v403_v1  ;;  %343 = vmatpush3.xpose.msra.mxu1 %v41_v0 }
   0x4   :  { %310 = vmatpush3.msra.mxu0 %v40_v2  ;;  %344 = vmatprep.subr.mxu1 %v403_v1 }
   0x5   :  { %311 = vmatprep.subr.mxu0 %v403_v1  ;;  %374 = vmatprep.mubr.msk.f32.mxu1 %vm404_vm0, %v403_v1 }
   0x6   :  { %11 = vsyncpa [#allocation3], 0  ;;  %312 = vmatpush3.msra.mxu0 %v39_v3  ;;  %v37_v5 = vld [vmem:[%s550_s1 + $0x58] sm:$0xff]  ;;  %v36_v6 = vld [vmem:[%s550_s1 + $0x50] sm:$0xff]  ;;  %v123_v23 = vlaneseq  ;;  %v405_v39 = vmov 1.0   ;;  %vm23_vm4 = vcmask 0  }
   0x7   :  { %313 = vmatprep.subr.mxu0 %v403_v1  ;;  %345 = vmatpush3.xpose.msra.mxu1 %v40_v2  ;;  %v35_v7 = vld [vmem:[%s550_s1 + $0x48] sm:$0xff]  ;;  %v34_v8 = vld [vmem:[%s550_s1 + $0x40] sm:$0xff]  ;;  %v33_v9 = vld [vmem:[%s550_s1 + $0x38] sm:$0xff]  ;;  %24 = vst.msk [vmem:[#allocation2] sm:$0x1] %vm23_vm4, %v403_v1 }
   0x8   :  { %314 = vmatpush3.msra.mxu0 %v38_v4  ;;  %346 = vmatprep.subr.mxu1 %v403_v1  ;;  %v32_v10 = vld [vmem:[%s550_s1 + $0x30] sm:$0xff]  ;;  %v31_v11 = vld [vmem:[%s550_s1 + $0x28] sm:$0xff]  ;;  %v30_v12 = vld [vmem:[%s550_s1 + $0x20] sm:$0xff]  ;;  %v124_v24 = vand.u32 127, %v123_v23 }
   0x9   :  { %315 = vmatprep.subr.mxu0 %v403_v1  ;;  %v29_v13 = vld [vmem:[%s550_s1 + $0x18] sm:$0xff]  ;;  %v28_v14 = vld [vmem:[%s550_s1 + $0x10] sm:$0xff]  ;;  %v27_v15 = vld [vmem:[%s550_s1 + $0x8] sm:$0xff] }
   0xa   :  { %316 = vmatpush3.msra.mxu0 %v37_v5  ;;  %v26_v16 = vld [vmem:[%s550_s1] sm:$0xff] }
   0xb   :  { %317 = vmatprep.subr.mxu0 %v403_v1  ;;  %347 = vmatpush3.xpose.msra.mxu1 %v39_v3  ;;  %v517_v17 = vld [vmem:[%s549_s0] sm:$0xff] }
   0xc   :  { %318 = vmatpush3.msra.mxu0 %v36_v6  ;;  %348 = vmatprep.subr.mxu1 %v403_v1  ;;  %v270_v19 = vld [vmem:[%s551_s2] ss:$0 sm:$0xff] }
   0xd   :  { %319 = vmatprep.subr.mxu0 %v403_v1  ;;  %v223_v45 = vld [vmem:[%s553_s4] sm:$0x1] }
   0xe   :  { %320 = vmatpush3.msra.mxu0 %v35_v7  ;;  %v242_v58 = vld [vmem:[#allocation2] sm:$0x1] }
   0xf   :  { %321 = vmatprep.subr.mxu0 %v403_v1  ;;  %349 = vmatpush3.xpose.msra.mxu1 %v38_v4 }
  0x10   :  { %322 = vmatpush3.msra.mxu0 %v34_v8  ;;  %350 = vmatprep.subr.mxu1 %v403_v1 }
  0x11   :  { %323 = vmatprep.subr.mxu0 %v403_v1 }
  0x12   :  { %324 = vmatpush3.msra.mxu0 %v33_v9 }
  0x13   :  { %325 = vmatprep.subr.mxu0 %v403_v1  ;;  %351 = vmatpush3.xpose.msra.mxu1 %v37_v5 }
  0x14   :  { %326 = vmatpush3.msra.mxu0 %v32_v10  ;;  %352 = vmatprep.subr.mxu1 %v403_v1 }
  0x15   :  { %327 = vmatprep.subr.mxu0 %v403_v1 }
  0x16   :  { %328 = vmatpush3.msra.mxu0 %v31_v11 }
  0x17   :  { %329 = vmatprep.subr.mxu0 %v403_v1  ;;  %353 = vmatpush3.xpose.msra.mxu1 %v36_v6 }
  0x18   :  { %330 = vmatpush3.msra.mxu0 %v30_v12  ;;  %354 = vmatprep.subr.mxu1 %v403_v1 }
  0x19   :  { %331 = vmatprep.subr.mxu0 %v403_v1 }
  0x1a   :  { %332 = vmatpush3.msra.mxu0 %v29_v13 }
  0x1b   :  { %333 = vmatprep.subr.mxu0 %v403_v1  ;;  %355 = vmatpush3.xpose.msra.mxu1 %v35_v7 }
  0x1c   :  { %334 = vmatpush3.msra.mxu0 %v28_v14  ;;  %356 = vmatprep.subr.mxu1 %v403_v1 }
  0x1d   :  { %335 = vmatprep.subr.mxu0 %v403_v1 }
  0x1e   :  { %336 = vmatpush3.msra.mxu0 %v27_v15 }
  0x1f   :  { %337 = vmatprep.subr.mxu0 %v403_v1  ;;  %357 = vmatpush3.xpose.msra.mxu1 %v34_v8 }
  0x20   :  { %338 = vmatpush3.msra.mxu0 %v26_v16  ;;  %358 = vmatprep.subr.mxu1 %v403_v1 }
  0x21   :  { %340 = vmatmul.mubr.f32.vlgmr.msra.gmra.mxu0 %v517_v17 }
  0x23   :  { %359 = vmatpush3.xpose.msra.mxu1 %v33_v9 }
  0x24   :  { %360 = vmatprep.subr.mxu1 %v403_v1 }
  0x27   :  { %361 = vmatpush3.xpose.msra.mxu1 %v32_v10 }
  0x28   :  { %362 = vmatprep.subr.mxu1 %v403_v1 }
  0x2b   :  { %363 = vmatpush3.xpose.msra.mxu1 %v31_v11 }
  0x2c   :  { %364 = vmatprep.subr.mxu1 %v403_v1 }
  0x2f   :  { %365 = vmatpush3.xpose.msra.mxu1 %v30_v12 }
  0x30   :  { %366 = vmatprep.subr.mxu1 %v403_v1 }
  0x33   :  { %367 = vmatpush3.xpose.msra.mxu1 %v29_v13 }
  0x34   :  { %368 = vmatprep.subr.mxu1 %v403_v1 }
  0x37   :  { %369 = vmatpush3.xpose.msra.mxu1 %v28_v14 }
  0x38   :  { %370 = vmatprep.subr.mxu1 %v403_v1 }
  0x3b   :  { %371 = vmatpush3.xpose.msra.mxu1 %v27_v15 }
  0x3c   :  { %372 = vmatprep.subr.mxu1 %v403_v1 }
  0x3f   :  { %373 = vmatpush3.xpose.msra.mxu1 %v26_v16 }
  0xe1   :  { %v108_v18 = vpop.f32.mrf.mxu0 }
  0xe2   :  { %v113_v20 = vmul.f32 2.0, %v108_v18 }
  0xe3   :  { %v341_v21 = vpop.f32.mrf.mxu0 }
  0xe4   :  { %v120_v22 = vsub.f32 %v270_v19, %v113_v20 }
  0xe6   :  { %121 = vmin.xlane.f32.xlu0 %v120_v22 }
 0x16f   :  { %v122_v25 = vpop.xlane.xlu0 %121 }
 0x170   :  { %vm125_vm1 = vcmp.le.f32.partialorder %v120_v22, %v122_v25 }
 0x171   :  { %v126_v26 = vsel %vm125_vm1, %v124_v24, 128 }
 0x172   :  { %v128_v27 = vshra.s32 %v126_v26, 16  ;;  %v127_v29 = vand.u32 65535, %v126_v26 }
 0x174   :  { %v130_v28 = vcvt.s32.f32 %v128_v27  ;;  %v129_v31 = vcvt.s32.f32 %v127_v29 }
 0x176   :  { %131 = vmin.xlane.f32.xlu0 %v130_v28 }
 0x1ff   :  { %v132_v30 = vpop.xlane.xlu0 %131 }
 0x200   :  { %vm133_vm2 = vcmp.eq.f32.partialorder %v130_v28, %v132_v30  ;;  %v138_v33 = vcvt.f32.s32 %v132_v30 }
 0x201   :  { %v134_v32 = vsel %vm133_vm2, %v129_v31, inf }
 0x202   :  { %135 = vmin.xlane.f32.xlu1 %v134_v32  ;;  %v139_v35 = vshll.u32 %v138_v33, 16 }
 0x28b   :  { %v136_v34 = vpop.xlane.xlu1 %135 }
 0x28c   :  { %v137_v36 = vcvt.f32.s32 %v136_v34 }
 0x28e   :  { %v140_v37 = vadd.s32 %v139_v35, %v137_v36 }
 0x290   :  { %vm141_vm3 = vcmp.eq.s32.totalorder %v124_v24, %v140_v37 }
 0x291   :  { %v271_v38 = vsel %vm141_vm3, 1.0, %v403_v1  ;;  %375 = vmatmul.mubr.msk.f32.vlgmr.msra.gmra.mxu1 %vm141_vm3, %v405_v39 }
 0x292   :  { %v225_v40 = vrot.slane %v271_v38, 4 }
 0x294   :  { %v226_v41 = vadd.f32 %v271_v38, %v225_v40 }
 0x296   :  { %v227_v42 = vrot.slane %v226_v41, 2 }
 0x298   :  { %v228_v43 = vadd.f32 %v227_v42, %v226_v41 }
 0x29a   :  { %v229_v44 = vrot.slane %v228_v43, 1 }
 0x29c   :  { %v230_v46 = vadd.f32 %v229_v44, %v228_v43 }
 0x29e   :  { %v231_v47 = vadd.f32 %v230_v46, %v223_v45 }
 0x2a0   :  { %232 = vst [vmem:[%s553_s4] sm:$0x1] %v231_v47  ;;  %s406_s4 = smov [#allocation2]  }
 0x2a1   :  { %s258_s9 = sshll.u32 %s406_s4, 4  ;;  %s259_s9 = int_to_ptr.vmem [resolvable:$true] %s258_s9 }
 0x2a2   :  { %s385_s10 = scalar_lea.vmem %s259_s9, 32  ;;  %p386_p1 = scmp.lt.s32.totalorder %s259_s9, %s259_s9 }
 0x351   :  { %v210_v48 = vpop.f32.mrf.mxu1 }
 0x352   :  { %214 = vst [vmem:[%s552_s3] sm:$0xff] %v210_v48  ;;  %v233_v49 = vsub.f32 %v210_v48, %v517_v17  ;;  %s381_s3 = scalar_lea.vmem %s259_s9, 16 }
 0x353   :  { %v376_v50 = vpop.f32.mrf.mxu1  ;;  %p382_p0 = scmp.ne.s32.totalorder %s259_s9, %s381_s3  ;;  %p387_p2 = scmp.lt.s32.totalorder %s385_s10, %s381_s3 }
 0x354   :  { %v235_v51 = vmul.f32 %v233_v49, %v233_v49 }
 0x355   :  { %p388_p3 = por %p387_p2, %p386_p1 }
 0x356   :  { %v236_v52 = vrot.slane %v235_v51, 4 }
 0x357   :  { %p389_p4 = pnand %p388_p3, %p382_p0 }
 0x358   :  { %v237_v53 = vadd.f32 %v236_v52, %v235_v51 }
 0x35a   :  { %v238_v54 = vrot.slane %v237_v53, 2 }
 0x35c   :  { %v239_v55 = vadd.f32 %v238_v54, %v237_v53 }
 0x35e   :  { %v240_v56 = vrot.slane %v239_v55, 1 }
 0x360   :  { %v241_v57 = vadd.f32 %v240_v56, %v239_v55 }
 0x362   :  { %243 = vadd.xlane.f32.xlu1 %v241_v57 }
 0x3eb   :  { %v244_v59 = vpop.xlane.xlu1 %243 }
 0x3ec   :  { %v245_v60 = vadd.f32 %v244_v59, %v242_v58 }
 0x3ee   :  { %247 = vst.msk [vmem:[#allocation2] sm:$0x1] %vm23_vm4, %v245_v60 }
 0x3ef   :  { %392 = shalt.err (!%p389_p4)
}
 0x3f0   :  { %261 = dma.vmem_to_hbm [thread:$0]  %s259_s9, 16, %s554_s5, [#allocation3]  }
 0x3f1   :  { %401 = dma.done.wait [#allocation3], 16  }
 0x3f2   :  { %402 = vsyncadd [#allocation3], 4294967280 }
 0x3f3   :  { %269 = vsyncpa [#allocation3], 1 }

// kernel: _lambda_.39
= control target key start
LH: loop header
LB: loop body
LE: loop exit
PB: predicated region body
PF: predicated region fallthrough
CT: control target
= control target key end

     0   :  { %v194_v0 = vmov 0.0   ;;  %vm195_vm0 = vmmov 0   ;;  %s249_s1 = inlined_call_operand.vmem [shape: bf16[128,128], index: 1, kind: input, shape index: {}]   ;;  %s250_s0 = inlined_call_operand.vmem [shape: bf16[8,128], index: 0, kind: input, shape index: {}]   ;;  %s251_s2 = inlined_call_operand.vmem [shape: f32[1,128], index: 2, kind: input, shape index: {}]   ;;  %s252_s3 = inlined_call_operand.vmem [shape: f32[8,128], index: 3, kind: output, shape index: {}]  }
   0x1   :  { %164 = vmatprep.subr.bf16.mxu0 %v194_v0  ;;  %v186_v1 = vld [vmem:[%s249_s1 + $0x38] sm:$0xff]   ;;  %180 = vmatprep.mubr.msk.bf16.mxu0 %vm195_vm0, %v194_v0  ;;  %v187_v2 = vld [vmem:[%s249_s1 + $0x30] sm:$0xff]   ;;  %v188_v3 = vld [vmem:[%s249_s1 + $0x28] sm:$0xff]  }
   0x2   :  { %165 = vmatpush3.bf16.msra.mxu0 %v186_v1  ;;  %v189_v4 = vld [vmem:[%s249_s1 + $0x20] sm:$0xff]   ;;  %v190_v5 = vld [vmem:[%s249_s1 + $0x18] sm:$0xff]   ;;  %v191_v6 = vld [vmem:[%s249_s1 + $0x10] sm:$0xff]  }
   0x3   :  { %166 = vmatprep.subr.bf16.mxu0 %v194_v0  ;;  %v192_v7 = vld [vmem:[%s249_s1 + $0x8] sm:$0xff]   ;;  %v193_v8 = vld [vmem:[%s249_s1] sm:$0xff]  }
   0x4   :  { %v20_v9 = vld [vmem:[%s250_s0] sm:$0xf] }
   0x5   :  { %v154_v10 = vld [vmem:[%s251_s2] ss:$0 sm:$0xff] }
   0x6   :  { %167 = vmatpush3.bf16.msra.mxu0 %v187_v2 }
   0x7   :  { %168 = vmatprep.subr.bf16.mxu0 %v194_v0 }
   0xa   :  { %169 = vmatpush3.bf16.msra.mxu0 %v188_v3 }
   0xb   :  { %170 = vmatprep.subr.bf16.mxu0 %v194_v0 }
   0xe   :  { %171 = vmatpush3.bf16.msra.mxu0 %v189_v4 }
   0xf   :  { %172 = vmatprep.subr.bf16.mxu0 %v194_v0 }
  0x12   :  { %173 = vmatpush3.bf16.msra.mxu0 %v190_v5 }
  0x13   :  { %174 = vmatprep.subr.bf16.mxu0 %v194_v0 }
  0x16   :  { %175 = vmatpush3.bf16.msra.mxu0 %v191_v6 }
  0x17   :  { %176 = vmatprep.subr.bf16.mxu0 %v194_v0 }
  0x1a   :  { %177 = vmatpush3.bf16.msra.mxu0 %v192_v7 }
  0x1b   :  { %178 = vmatprep.subr.bf16.mxu0 %v194_v0 }
  0x1e   :  { %179 = vmatpush3.bf16.msra.mxu0 %v193_v8 }
  0x21   :  { %181 = vmatmul.mubr.bf16.vlgmr.msra.gmra.mxu0 %v20_v9 }
  0xe1   :  { %v120_v11 = vpop.f32.mrf.mxu0 }
  0xe2   :  { %v139_v12 = vadd.f32 %v154_v10, %v120_v11 }
  0xe3   :  { %v182_v13 = vpop.f32.mrf.mxu0 }
  0xe4   :  { %v140_v14 = vmax.f32 %v139_v12, 0.0 }
  0xe5   :  { %v123_v15 = vpop.f32.mrf.mxu0 }
  0xe6   :  { %141 = vst [vmem:[%s252_s3] sm:$0xff] %v140_v14 }
  0xe7   :  { %v183_v16 = vpop.f32.mrf.mxu0 }

// kernel: _lambda_.49
= control target key start
LH: loop header
LB: loop body
LE: loop exit
PB: predicated region body
PF: predicated region fallthrough
CT: control target
= control target key end

     0   :  { %s306_s1 = inlined_call_operand.vmem [shape: bf16[128,128], index: 1, kind: input, shape index: {}]   ;;  %s307_s0 = inlined_call_operand.vmem [shape: bf16[32,128], index: 0, kind: input, shape index: {}]   ;;  %s308_s2 = inlined_call_operand.vmem [shape: f32[1,128], index: 2, kind: input, shape index: {}]   ;;  %s309_s3 = inlined_call_operand.vmem [shape: f32[32,128], index: 3, kind: output, shape index: {}]  }
   0x1   :  { %v231_v0 = vld [vmem:[%s306_s1 + $0x38] sm:$0xff]   ;;  %v232_v1 = vld [vmem:[%s306_s1 + $0x30] sm:$0xff]   ;;  %v233_v2 = vld [vmem:[%s306_s1 + $0x28] sm:$0xff]  }
   0x2   :  { %211 = vmatprep.subr.bf16.mxu0 %v231_v0  ;;  %v234_v3 = vld [vmem:[%s306_s1 + $0x20] sm:$0xff]   ;;  %v235_v5 = vld [vmem:[%s306_s1 + $0x18] sm:$0xff]   ;;  %v236_v6 = vld [vmem:[%s306_s1 + $0x10] sm:$0xff]  }
   0x3   :  { %212 = vmatpush3.bf16.msra.mxu0 %v231_v0  ;;  %v239_v4 = vld [vmem:[%s307_s0] sm:$0xff]   ;;  %v237_v7 = vld [vmem:[%s306_s1 + $0x8] sm:$0xff]  }
   0x4   :  { %213 = vmatprep.subr.bf16.mxu0 %v232_v1  ;;  %227 = vmatprep.mubr.bf16.mxu0 %v239_v4  ;;  %v238_v8 = vld [vmem:[%s306_s1] sm:$0xff]   ;;  %v240_v9 = vld [vmem:[%s307_s0 + $0x8] sm:$0xff]  }
   0x5   :  { %v200_v10 = vld [vmem:[%s308_s2] ss:$0 sm:$0xff] }
   0x7   :  { %214 = vmatpush3.bf16.msra.mxu0 %v232_v1 }
   0x8   :  { %215 = vmatprep.subr.bf16.mxu0 %v233_v2 }
   0xb   :  { %216 = vmatpush3.bf16.msra.mxu0 %v233_v2 }
   0xc   :  { %217 = vmatprep.subr.bf16.mxu0 %v234_v3 }
   0xf   :  { %218 = vmatpush3.bf16.msra.mxu0 %v234_v3 }
  0x10   :  { %219 = vmatprep.subr.bf16.mxu0 %v235_v5 }
  0x13   :  { %220 = vmatpush3.bf16.msra.mxu0 %v235_v5 }
  0x14   :  { %221 = vmatprep.subr.bf16.mxu0 %v236_v6 }
  0x17   :  { %222 = vmatpush3.bf16.msra.mxu0 %v236_v6 }
  0x18   :  { %223 = vmatprep.subr.bf16.mxu0 %v237_v7 }
  0x1b   :  { %224 = vmatpush3.bf16.msra.mxu0 %v237_v7 }
  0x1c   :  { %225 = vmatprep.subr.bf16.mxu0 %v238_v8 }
  0x1f   :  { %226 = vmatpush3.bf16.msra.mxu0 %v238_v8 }
  0x22   :  { %228 = vmatmul.mubr.bf16.vlgmr.msra.gmra.mxu0 %v240_v9 }
  0xe2   :  { %v229_v11 = vpop.f32.mrf.mxu0 }
  0xe3   :  { %v180_v12 = vadd.f32 %v229_v11, %v200_v10 }
  0xe4   :  { %v141_v13 = vpop.f32.mrf.mxu0 }
  0xe5   :  { %184 = vst [vmem:[%s309_s3 + $0x10] sm:$0xff] %v180_v12  ;;  %v178_v14 = vadd.f32 %v200_v10, %v141_v13 }
  0xe6   :  { %v230_v15 = vpop.f32.mrf.mxu0 }
  0xe7   :  { %182 = vst [vmem:[%s309_s3] sm:$0xff] %v178_v14  ;;  %v181_v16 = vadd.f32 %v230_v15, %v200_v10 }
  0xe8   :  { %v144_v17 = vpop.f32.mrf.mxu0 }
  0xe9   :  { %185 = vst [vmem:[%s309_s3 + $0x18] sm:$0xff] %v181_v16  ;;  %v179_v18 = vadd.f32 %v200_v10, %v144_v17 }
  0xeb   :  { %183 = vst [vmem:[%s309_s3 + $0x8] sm:$0xff] %v179_v18 }

</bundles_post_ra>
